<compile_context>
chip_gen: v5e
topology: v5e:2x2
jax: 0.10.0
libtpu: 0.0.40
codegen_flags: <defaults>
</compile_context>

<pallas_src>
import functools

import jax
import jax.numpy as jnp
from jax.experimental import pallas as pl
from jax.experimental.pallas import tpu as pltpu

EPS = 1e-5
NEG_SLOPE = 0.2
KH = KW = 4          # Conv2d kernel_size=4
STRIDE = 2
PAD = 1


def _shrink_kernel(p_ref, w_ref, g_ref, b_ref, out_ref, *, ktaps, m):
    """Fused Conv4x4(s2,p1,no-bias) + BatchNorm2d(batch stats) + LeakyReLU(0.2).

    p_ref:   VMEM (ktaps, 1, M)   -- im2col rows, M = n*oh*ow lanes (lane-dense).
    w_ref:   VMEM (ktaps, cout, 1)-- per-tap weight columns (cout on sublanes).
    g_ref:   VMEM (cout, 1)       -- BatchNorm gamma.
    b_ref:   VMEM (cout, 1)       -- BatchNorm beta.
    out_ref: VMEM (cout, M).
    """
    # ---- Conv: 64 vectorized broadcast multiply-accumulates -----------------
    acc = w_ref[0] * p_ref[0]                      # (cout,1)*(1,M) -> (cout,M)
    for t in range(1, ktaps):
        acc = acc + w_ref[t] * p_ref[t]

    # ---- BatchNorm2d (training-mode batch stats), batched over channels -----
    inv_cnt = 1.0 / float(m)
    mean = jnp.sum(acc, axis=-1, keepdims=True) * inv_cnt           # (cout,1)
    centered = acc - mean
    var = jnp.sum(centered * centered, axis=-1, keepdims=True) * inv_cnt
    scale = g_ref[...] * jax.lax.rsqrt(var + EPS)                   # (cout,1)
    y = centered * scale + b_ref[...]

    # ---- LeakyReLU(0.2) + single unmasked (cout, M) store --------------------
    out_ref[...] = jnp.maximum(y, NEG_SLOPE * y)


def _im2col(x, oh, ow):
    """Layout plumbing (wrapper side): (N,Cin,H,W) -> (Cin*KH*KW, 1, N*oh*ow)."""
    n, cin, _, _ = x.shape
    xp = jnp.pad(x, ((0, 0), (0, 0), (PAD, PAD), (PAD, PAD)))
    rows = []
    for ci in range(cin):
        for ky in range(KH):
            for kx in range(KW):
                win = xp[:, ci,
                         ky:ky + STRIDE * (oh - 1) + 1:STRIDE,
                         kx:kx + STRIDE * (ow - 1) + 1:STRIDE]      # (n,oh,ow)
                rows.append(win.reshape(1, 1, -1))
    # XLA fuses the pad + strided slices + concat into one fusion feeding the
    # pallas_call, keeping wrapper-op launch overhead minimal (v5e concern).
    return jnp.concatenate(rows, axis=0)


def shrink_forward(x, w, gamma, beta):
    """x: (N, Cin, H, W) f32;  w: (Cout, Cin, 4, 4) f32;  gamma/beta: (Cout,) f32."""
    n, cin, h, wd = x.shape
    cout = w.shape[0]
    oh = (h + 2 * PAD - KH) // STRIDE + 1
    ow = (wd + 2 * PAD - KW) // STRIDE + 1
    m = n * oh * ow
    ktaps = cin * KH * KW

    patches = _im2col(x, oh, ow)                                  # (ktaps,1,m)
    # OIHW -> per-tap (ci,ky,kx ordered) weight columns: (ktaps, cout, 1).
    w_taps = w.reshape(cout, ktaps).T.reshape(ktaps, cout, 1)
    g = gamma.reshape(cout, 1).astype(jnp.float32)
    b = beta.reshape(cout, 1).astype(jnp.float32)

    vmem = pl.BlockSpec(memory_space=pltpu.MemorySpace.VMEM)
    kernel = functools.partial(_shrink_kernel, ktaps=ktaps, m=m)
    out = pl.pallas_call(
        kernel,
        out_shape=jax.ShapeDtypeStruct((cout, m), jnp.float32),
        in_specs=[vmem, vmem, vmem, vmem],
        out_specs=vmem,
    )(patches, w_taps, g, b)

    # (cout, n*oh*ow) -> (N, Cout, oh, ow)  (layout plumbing, outside the kernel)
    return out.reshape(cout, n, oh, ow).transpose(1, 0, 2, 3)


if __name__ == "__main__":
    key = jax.random.PRNGKey(0)
    ks = jax.random.split(key, 2)

    N, CIN, COUT, H, W = 2, 4, 8, 16, 16

    # PyTorch Conv2d default init is uniform(-1/sqrt(fan_in), 1/sqrt(fan_in)).
    fan_in = CIN * KH * KW
    bound = 1.0 / float(fan_in) ** 0.5
    w = jax.random.uniform(ks[0], (COUT, CIN, KH, KW), jnp.float32, -bound, bound)
    gamma = jnp.ones((COUT,), jnp.float32)   # BatchNorm2d affine init
    beta = jnp.zeros((COUT,), jnp.float32)
    x = jax.random.normal(ks[1], (N, CIN, H, W), jnp.float32)

    out = shrink_forward(x, w, gamma, beta)
    jax.block_until_ready(out)
    assert out.shape == (N, COUT, H // 2, W // 2)

    # Pure-JAX reference with identical forward semantics (sanity check).
    conv = jax.lax.conv_general_dilated(
        x, w, window_strides=(STRIDE, STRIDE), padding=((PAD, PAD), (PAD, PAD)),
        dimension_numbers=("NCHW", "OIHW", "NCHW"),
        precision=jax.lax.Precision.HIGHEST)
    mean = jnp.mean(conv, axis=(0, 2, 3), keepdims=True)
    var = jnp.mean((conv - mean) ** 2, axis=(0, 2, 3), keepdims=True)
    bn = (conv - mean) * jax.lax.rsqrt(var + EPS) * gamma.reshape(1, -1, 1, 1) \
        + beta.reshape(1, -1, 1, 1)
    ref = jnp.where(bn >= 0, bn, NEG_SLOPE * bn)
    assert jnp.allclose(out, ref, atol=2e-3, rtol=2e-3), \
        float(jnp.max(jnp.abs(out - ref)))

    print("KERNEL_OK")
</pallas_src>

<mosaic_0001>
module attributes {stable_mosaic.version = 11 : i64} {
  func.func @_shrink_kernel(%arg0: memref<64x1x128xf32, #tpu.memory_space<vmem>>, %arg1: memref<64x8x1xf32, #tpu.memory_space<vmem>>, %arg2: memref<8x1xf32, #tpu.memory_space<vmem>>, %arg3: memref<8x1xf32, #tpu.memory_space<vmem>>, %arg4: memref<8x128xf32, #tpu.memory_space<vmem>>) attributes {dimension_semantics = [], scalar_prefetch = 0 : i64, scratch_operands = 0 : i64, tpu.core_type = #tpu.core_type<tc>} {
    %c0 = arith.constant 0 : index
    %c0_0 = arith.constant 0 : index
    %c0_1 = arith.constant 0 : index
    %0 = vector.load %arg1[%c0, %c0_0, %c0_1] : memref<64x8x1xf32, #tpu.memory_space<vmem>>, vector<1x8x1xf32>
    %1 = vector.shape_cast %0 : vector<1x8x1xf32> to vector<8x1xf32>
    %c0_2 = arith.constant 0 : index
    %c0_3 = arith.constant 0 : index
    %c0_4 = arith.constant 0 : index
    %2 = vector.load %arg0[%c0_2, %c0_3, %c0_4] : memref<64x1x128xf32, #tpu.memory_space<vmem>>, vector<1x1x128xf32>
    %3 = vector.shape_cast %2 : vector<1x1x128xf32> to vector<1x128xf32>
    %4 = vector.broadcast %1 : vector<8x1xf32> to vector<8x128xf32>
    %5 = vector.broadcast %3 : vector<1x128xf32> to vector<8x128xf32>
    %6 = arith.mulf %4, %5 : vector<8x128xf32>
    %c1 = arith.constant 1 : index
    %c0_5 = arith.constant 0 : index
    %c0_6 = arith.constant 0 : index
    %7 = vector.load %arg1[%c1, %c0_5, %c0_6] : memref<64x8x1xf32, #tpu.memory_space<vmem>>, vector<1x8x1xf32>
    %8 = vector.shape_cast %7 : vector<1x8x1xf32> to vector<8x1xf32>
    %c1_7 = arith.constant 1 : index
    %c0_8 = arith.constant 0 : index
    %c0_9 = arith.constant 0 : index
    %9 = vector.load %arg0[%c1_7, %c0_8, %c0_9] : memref<64x1x128xf32, #tpu.memory_space<vmem>>, vector<1x1x128xf32>
    %10 = vector.shape_cast %9 : vector<1x1x128xf32> to vector<1x128xf32>
    %11 = vector.broadcast %8 : vector<8x1xf32> to vector<8x128xf32>
    %12 = vector.broadcast %10 : vector<1x128xf32> to vector<8x128xf32>
    %13 = arith.mulf %11, %12 : vector<8x128xf32>
    %14 = arith.addf %6, %13 : vector<8x128xf32>
    %c2 = arith.constant 2 : index
    %c0_10 = arith.constant 0 : index
    %c0_11 = arith.constant 0 : index
    %15 = vector.load %arg1[%c2, %c0_10, %c0_11] : memref<64x8x1xf32, #tpu.memory_space<vmem>>, vector<1x8x1xf32>
    %16 = vector.shape_cast %15 : vector<1x8x1xf32> to vector<8x1xf32>
    %c2_12 = arith.constant 2 : index
    %c0_13 = arith.constant 0 : index
    %c0_14 = arith.constant 0 : index
    %17 = vector.load %arg0[%c2_12, %c0_13, %c0_14] : memref<64x1x128xf32, #tpu.memory_space<vmem>>, vector<1x1x128xf32>
    %18 = vector.shape_cast %17 : vector<1x1x128xf32> to vector<1x128xf32>
    %19 = vector.broadcast %16 : vector<8x1xf32> to vector<8x128xf32>
    %20 = vector.broadcast %18 : vector<1x128xf32> to vector<8x128xf32>
    %21 = arith.mulf %19, %20 : vector<8x128xf32>
    %22 = arith.addf %14, %21 : vector<8x128xf32>
    %c3 = arith.constant 3 : index
    %c0_15 = arith.constant 0 : index
    %c0_16 = arith.constant 0 : index
    %23 = vector.load %arg1[%c3, %c0_15, %c0_16] : memref<64x8x1xf32, #tpu.memory_space<vmem>>, vector<1x8x1xf32>
    %24 = vector.shape_cast %23 : vector<1x8x1xf32> to vector<8x1xf32>
    %c3_17 = arith.constant 3 : index
    %c0_18 = arith.constant 0 : index
    %c0_19 = arith.constant 0 : index
    %25 = vector.load %arg0[%c3_17, %c0_18, %c0_19] : memref<64x1x128xf32, #tpu.memory_space<vmem>>, vector<1x1x128xf32>
    %26 = vector.shape_cast %25 : vector<1x1x128xf32> to vector<1x128xf32>
    %27 = vector.broadcast %24 : vector<8x1xf32> to vector<8x128xf32>
    %28 = vector.broadcast %26 : vector<1x128xf32> to vector<8x128xf32>
    %29 = arith.mulf %27, %28 : vector<8x128xf32>
    %30 = arith.addf %22, %29 : vector<8x128xf32>
    %c4 = arith.constant 4 : index
    %c0_20 = arith.constant 0 : index
    %c0_21 = arith.constant 0 : index
    %31 = vector.load %arg1[%c4, %c0_20, %c0_21] : memref<64x8x1xf32, #tpu.memory_space<vmem>>, vector<1x8x1xf32>
    %32 = vector.shape_cast %31 : vector<1x8x1xf32> to vector<8x1xf32>
    %c4_22 = arith.constant 4 : index
    %c0_23 = arith.constant 0 : index
    %c0_24 = arith.constant 0 : index
    %33 = vector.load %arg0[%c4_22, %c0_23, %c0_24] : memref<64x1x128xf32, #tpu.memory_space<vmem>>, vector<1x1x128xf32>
    %34 = vector.shape_cast %33 : vector<1x1x128xf32> to vector<1x128xf32>
    %35 = vector.broadcast %32 : vector<8x1xf32> to vector<8x128xf32>
    %36 = vector.broadcast %34 : vector<1x128xf32> to vector<8x128xf32>
    %37 = arith.mulf %35, %36 : vector<8x128xf32>
    %38 = arith.addf %30, %37 : vector<8x128xf32>
    %c5 = arith.constant 5 : index
    %c0_25 = arith.constant 0 : index
    %c0_26 = arith.constant 0 : index
    %39 = vector.load %arg1[%c5, %c0_25, %c0_26] : memref<64x8x1xf32, #tpu.memory_space<vmem>>, vector<1x8x1xf32>
    %40 = vector.shape_cast %39 : vector<1x8x1xf32> to vector<8x1xf32>
    %c5_27 = arith.constant 5 : index
    %c0_28 = arith.constant 0 : index
    %c0_29 = arith.constant 0 : index
    %41 = vector.load %arg0[%c5_27, %c0_28, %c0_29] : memref<64x1x128xf32, #tpu.memory_space<vmem>>, vector<1x1x128xf32>
    %42 = vector.shape_cast %41 : vector<1x1x128xf32> to vector<1x128xf32>
    %43 = vector.broadcast %40 : vector<8x1xf32> to vector<8x128xf32>
    %44 = vector.broadcast %42 : vector<1x128xf32> to vector<8x128xf32>
    %45 = arith.mulf %43, %44 : vector<8x128xf32>
    %46 = arith.addf %38, %45 : vector<8x128xf32>
    %c6 = arith.constant 6 : index
    %c0_30 = arith.constant 0 : index
    %c0_31 = arith.constant 0 : index
    %47 = vector.load %arg1[%c6, %c0_30, %c0_31] : memref<64x8x1xf32, #tpu.memory_space<vmem>>, vector<1x8x1xf32>
    %48 = vector.shape_cast %47 : vector<1x8x1xf32> to vector<8x1xf32>
    %c6_32 = arith.constant 6 : index
    %c0_33 = arith.constant 0 : index
    %c0_34 = arith.constant 0 : index
    %49 = vector.load %arg0[%c6_32, %c0_33, %c0_34] : memref<64x1x128xf32, #tpu.memory_space<vmem>>, vector<1x1x128xf32>
    %50 = vector.shape_cast %49 : vector<1x1x128xf32> to vector<1x128xf32>
    %51 = vector.broadcast %48 : vector<8x1xf32> to vector<8x128xf32>
    %52 = vector.broadcast %50 : vector<1x128xf32> to vector<8x128xf32>
    %53 = arith.mulf %51, %52 : vector<8x128xf32>
    %54 = arith.addf %46, %53 : vector<8x128xf32>
    %c7 = arith.constant 7 : index
    %c0_35 = arith.constant 0 : index
    %c0_36 = arith.constant 0 : index
    %55 = vector.load %arg1[%c7, %c0_35, %c0_36] : memref<64x8x1xf32, #tpu.memory_space<vmem>>, vector<1x8x1xf32>
    %56 = vector.shape_cast %55 : vector<1x8x1xf32> to vector<8x1xf32>
    %c7_37 = arith.constant 7 : index
    %c0_38 = arith.constant 0 : index
    %c0_39 = arith.constant 0 : index
    %57 = vector.load %arg0[%c7_37, %c0_38, %c0_39] : memref<64x1x128xf32, #tpu.memory_space<vmem>>, vector<1x1x128xf32>
    %58 = vector.shape_cast %57 : vector<1x1x128xf32> to vector<1x128xf32>
    %59 = vector.broadcast %56 : vector<8x1xf32> to vector<8x128xf32>
    %60 = vector.broadcast %58 : vector<1x128xf32> to vector<8x128xf32>
    %61 = arith.mulf %59, %60 : vector<8x128xf32>
    %62 = arith.addf %54, %61 : vector<8x128xf32>
    %c8 = arith.constant 8 : index
    %c0_40 = arith.constant 0 : index
    %c0_41 = arith.constant 0 : index
    %63 = vector.load %arg1[%c8, %c0_40, %c0_41] : memref<64x8x1xf32, #tpu.memory_space<vmem>>, vector<1x8x1xf32>
    %64 = vector.shape_cast %63 : vector<1x8x1xf32> to vector<8x1xf32>
    %c8_42 = arith.constant 8 : index
    %c0_43 = arith.constant 0 : index
    %c0_44 = arith.constant 0 : index
    %65 = vector.load %arg0[%c8_42, %c0_43, %c0_44] : memref<64x1x128xf32, #tpu.memory_space<vmem>>, vector<1x1x128xf32>
    %66 = vector.shape_cast %65 : vector<1x1x128xf32> to vector<1x128xf32>
    %67 = vector.broadcast %64 : vector<8x1xf32> to vector<8x128xf32>
    %68 = vector.broadcast %66 : vector<1x128xf32> to vector<8x128xf32>
    %69 = arith.mulf %67, %68 : vector<8x128xf32>
    %70 = arith.addf %62, %69 : vector<8x128xf32>
    %c9 = arith.constant 9 : index
    %c0_45 = arith.constant 0 : index
    %c0_46 = arith.constant 0 : index
    %71 = vector.load %arg1[%c9, %c0_45, %c0_46] : memref<64x8x1xf32, #tpu.memory_space<vmem>>, vector<1x8x1xf32>
    %72 = vector.shape_cast %71 : vector<1x8x1xf32> to vector<8x1xf32>
    %c9_47 = arith.constant 9 : index
    %c0_48 = arith.constant 0 : index
    %c0_49 = arith.constant 0 : index
    %73 = vector.load %arg0[%c9_47, %c0_48, %c0_49] : memref<64x1x128xf32, #tpu.memory_space<vmem>>, vector<1x1x128xf32>
    %74 = vector.shape_cast %73 : vector<1x1x128xf32> to vector<1x128xf32>
    %75 = vector.broadcast %72 : vector<8x1xf32> to vector<8x128xf32>
    %76 = vector.broadcast %74 : vector<1x128xf32> to vector<8x128xf32>
    %77 = arith.mulf %75, %76 : vector<8x128xf32>
    %78 = arith.addf %70, %77 : vector<8x128xf32>
    %c10 = arith.constant 10 : index
    %c0_50 = arith.constant 0 : index
    %c0_51 = arith.constant 0 : index
    %79 = vector.load %arg1[%c10, %c0_50, %c0_51] : memref<64x8x1xf32, #tpu.memory_space<vmem>>, vector<1x8x1xf32>
    %80 = vector.shape_cast %79 : vector<1x8x1xf32> to vector<8x1xf32>
    %c10_52 = arith.constant 10 : index
    %c0_53 = arith.constant 0 : index
    %c0_54 = arith.constant 0 : index
    %81 = vector.load %arg0[%c10_52, %c0_53, %c0_54] : memref<64x1x128xf32, #tpu.memory_space<vmem>>, vector<1x1x128xf32>
    %82 = vector.shape_cast %81 : vector<1x1x128xf32> to vector<1x128xf32>
    %83 = vector.broadcast %80 : vector<8x1xf32> to vector<8x128xf32>
    %84 = vector.broadcast %82 : vector<1x128xf32> to vector<8x128xf32>
    %85 = arith.mulf %83, %84 : vector<8x128xf32>
    %86 = arith.addf %78, %85 : vector<8x128xf32>
    %c11 = arith.constant 11 : index
    %c0_55 = arith.constant 0 : index
    %c0_56 = arith.constant 0 : index
    %87 = vector.load %arg1[%c11, %c0_55, %c0_56] : memref<64x8x1xf32, #tpu.memory_space<vmem>>, vector<1x8x1xf32>
    %88 = vector.shape_cast %87 : vector<1x8x1xf32> to vector<8x1xf32>
    %c11_57 = arith.constant 11 : index
    %c0_58 = arith.constant 0 : index
    %c0_59 = arith.constant 0 : index
    %89 = vector.load %arg0[%c11_57, %c0_58, %c0_59] : memref<64x1x128xf32, #tpu.memory_space<vmem>>, vector<1x1x128xf32>
    %90 = vector.shape_cast %89 : vector<1x1x128xf32> to vector<1x128xf32>
    %91 = vector.broadcast %88 : vector<8x1xf32> to vector<8x128xf32>
    %92 = vector.broadcast %90 : vector<1x128xf32> to vector<8x128xf32>
    %93 = arith.mulf %91, %92 : vector<8x128xf32>
    %94 = arith.addf %86, %93 : vector<8x128xf32>
    %c12 = arith.constant 12 : index
    %c0_60 = arith.constant 0 : index
    %c0_61 = arith.constant 0 : index
    %95 = vector.load %arg1[%c12, %c0_60, %c0_61] : memref<64x8x1xf32, #tpu.memory_space<vmem>>, vector<1x8x1xf32>
    %96 = vector.shape_cast %95 : vector<1x8x1xf32> to vector<8x1xf32>
    %c12_62 = arith.constant 12 : index
    %c0_63 = arith.constant 0 : index
    %c0_64 = arith.constant 0 : index
    %97 = vector.load %arg0[%c12_62, %c0_63, %c0_64] : memref<64x1x128xf32, #tpu.memory_space<vmem>>, vector<1x1x128xf32>
    %98 = vector.shape_cast %97 : vector<1x1x128xf32> to vector<1x128xf32>
    %99 = vector.broadcast %96 : vector<8x1xf32> to vector<8x128xf32>
    %100 = vector.broadcast %98 : vector<1x128xf32> to vector<8x128xf32>
    %101 = arith.mulf %99, %100 : vector<8x128xf32>
    %102 = arith.addf %94, %101 : vector<8x128xf32>
    %c13 = arith.constant 13 : index
    %c0_65 = arith.constant 0 : index
    %c0_66 = arith.constant 0 : index
    %103 = vector.load %arg1[%c13, %c0_65, %c0_66] : memref<64x8x1xf32, #tpu.memory_space<vmem>>, vector<1x8x1xf32>
    %104 = vector.shape_cast %103 : vector<1x8x1xf32> to vector<8x1xf32>
    %c13_67 = arith.constant 13 : index
    %c0_68 = arith.constant 0 : index
    %c0_69 = arith.constant 0 : index
    %105 = vector.load %arg0[%c13_67, %c0_68, %c0_69] : memref<64x1x128xf32, #tpu.memory_space<vmem>>, vector<1x1x128xf32>
    %106 = vector.shape_cast %105 : vector<1x1x128xf32> to vector<1x128xf32>
    %107 = vector.broadcast %104 : vector<8x1xf32> to vector<8x128xf32>
    %108 = vector.broadcast %106 : vector<1x128xf32> to vector<8x128xf32>
    %109 = arith.mulf %107, %108 : vector<8x128xf32>
    %110 = arith.addf %102, %109 : vector<8x128xf32>
    %c14 = arith.constant 14 : index
    %c0_70 = arith.constant 0 : index
    %c0_71 = arith.constant 0 : index
    %111 = vector.load %arg1[%c14, %c0_70, %c0_71] : memref<64x8x1xf32, #tpu.memory_space<vmem>>, vector<1x8x1xf32>
    %112 = vector.shape_cast %111 : vector<1x8x1xf32> to vector<8x1xf32>
    %c14_72 = arith.constant 14 : index
    %c0_73 = arith.constant 0 : index
    %c0_74 = arith.constant 0 : index
    %113 = vector.load %arg0[%c14_72, %c0_73, %c0_74] : memref<64x1x128xf32, #tpu.memory_space<vmem>>, vector<1x1x128xf32>
    %114 = vector.shape_cast %113 : vector<1x1x128xf32> to vector<1x128xf32>
    %115 = vector.broadcast %112 : vector<8x1xf32> to vector<8x128xf32>
    %116 = vector.broadcast %114 : vector<1x128xf32> to vector<8x128xf32>
    %117 = arith.mulf %115, %116 : vector<8x128xf32>
    %118 = arith.addf %110, %117 : vector<8x128xf32>
    %c15 = arith.constant 15 : index
    %c0_75 = arith.constant 0 : index
    %c0_76 = arith.constant 0 : index
    %119 = vector.load %arg1[%c15, %c0_75, %c0_76] : memref<64x8x1xf32, #tpu.memory_space<vmem>>, vector<1x8x1xf32>
    %120 = vector.shape_cast %119 : vector<1x8x1xf32> to vector<8x1xf32>
    %c15_77 = arith.constant 15 : index
    %c0_78 = arith.constant 0 : index
    %c0_79 = arith.constant 0 : index
    %121 = vector.load %arg0[%c15_77, %c0_78, %c0_79] : memref<64x1x128xf32, #tpu.memory_space<vmem>>, vector<1x1x128xf32>
    %122 = vector.shape_cast %121 : vector<1x1x128xf32> to vector<1x128xf32>
    %123 = vector.broadcast %120 : vector<8x1xf32> to vector<8x128xf32>
    %124 = vector.broadcast %122 : vector<1x128xf32> to vector<8x128xf32>
    %125 = arith.mulf %123, %124 : vector<8x128xf32>
    %126 = arith.addf %118, %125 : vector<8x128xf32>
    %c16 = arith.constant 16 : index
    %c0_80 = arith.constant 0 : index
    %c0_81 = arith.constant 0 : index
    %127 = vector.load %arg1[%c16, %c0_80, %c0_81] : memref<64x8x1xf32, #tpu.memory_space<vmem>>, vector<1x8x1xf32>
    %128 = vector.shape_cast %127 : vector<1x8x1xf32> to vector<8x1xf32>
    %c16_82 = arith.constant 16 : index
    %c0_83 = arith.constant 0 : index
    %c0_84 = arith.constant 0 : index
    %129 = vector.load %arg0[%c16_82, %c0_83, %c0_84] : memref<64x1x128xf32, #tpu.memory_space<vmem>>, vector<1x1x128xf32>
    %130 = vector.shape_cast %129 : vector<1x1x128xf32> to vector<1x128xf32>
    %131 = vector.broadcast %128 : vector<8x1xf32> to vector<8x128xf32>
    %132 = vector.broadcast %130 : vector<1x128xf32> to vector<8x128xf32>
    %133 = arith.mulf %131, %132 : vector<8x128xf32>
    %134 = arith.addf %126, %133 : vector<8x128xf32>
    %c17 = arith.constant 17 : index
    %c0_85 = arith.constant 0 : index
    %c0_86 = arith.constant 0 : index
    %135 = vector.load %arg1[%c17, %c0_85, %c0_86] : memref<64x8x1xf32, #tpu.memory_space<vmem>>, vector<1x8x1xf32>
    %136 = vector.shape_cast %135 : vector<1x8x1xf32> to vector<8x1xf32>
    %c17_87 = arith.constant 17 : index
    %c0_88 = arith.constant 0 : index
    %c0_89 = arith.constant 0 : index
    %137 = vector.load %arg0[%c17_87, %c0_88, %c0_89] : memref<64x1x128xf32, #tpu.memory_space<vmem>>, vector<1x1x128xf32>
    %138 = vector.shape_cast %137 : vector<1x1x128xf32> to vector<1x128xf32>
    %139 = vector.broadcast %136 : vector<8x1xf32> to vector<8x128xf32>
    %140 = vector.broadcast %138 : vector<1x128xf32> to vector<8x128xf32>
    %141 = arith.mulf %139, %140 : vector<8x128xf32>
    %142 = arith.addf %134, %141 : vector<8x128xf32>
    %c18 = arith.constant 18 : index
    %c0_90 = arith.constant 0 : index
    %c0_91 = arith.constant 0 : index
    %143 = vector.load %arg1[%c18, %c0_90, %c0_91] : memref<64x8x1xf32, #tpu.memory_space<vmem>>, vector<1x8x1xf32>
    %144 = vector.shape_cast %143 : vector<1x8x1xf32> to vector<8x1xf32>
    %c18_92 = arith.constant 18 : index
    %c0_93 = arith.constant 0 : index
    %c0_94 = arith.constant 0 : index
    %145 = vector.load %arg0[%c18_92, %c0_93, %c0_94] : memref<64x1x128xf32, #tpu.memory_space<vmem>>, vector<1x1x128xf32>
    %146 = vector.shape_cast %145 : vector<1x1x128xf32> to vector<1x128xf32>
    %147 = vector.broadcast %144 : vector<8x1xf32> to vector<8x128xf32>
    %148 = vector.broadcast %146 : vector<1x128xf32> to vector<8x128xf32>
    %149 = arith.mulf %147, %148 : vector<8x128xf32>
    %150 = arith.addf %142, %149 : vector<8x128xf32>
    %c19 = arith.constant 19 : index
    %c0_95 = arith.constant 0 : index
    %c0_96 = arith.constant 0 : index
    %151 = vector.load %arg1[%c19, %c0_95, %c0_96] : memref<64x8x1xf32, #tpu.memory_space<vmem>>, vector<1x8x1xf32>
    %152 = vector.shape_cast %151 : vector<1x8x1xf32> to vector<8x1xf32>
    %c19_97 = arith.constant 19 : index
    %c0_98 = arith.constant 0 : index
    %c0_99 = arith.constant 0 : index
    %153 = vector.load %arg0[%c19_97, %c0_98, %c0_99] : memref<64x1x128xf32, #tpu.memory_space<vmem>>, vector<1x1x128xf32>
    %154 = vector.shape_cast %153 : vector<1x1x128xf32> to vector<1x128xf32>
    %155 = vector.broadcast %152 : vector<8x1xf32> to vector<8x128xf32>
    %156 = vector.broadcast %154 : vector<1x128xf32> to vector<8x128xf32>
    %157 = arith.mulf %155, %156 : vector<8x128xf32>
    %158 = arith.addf %150, %157 : vector<8x128xf32>
    %c20 = arith.constant 20 : index
    %c0_100 = arith.constant 0 : index
    %c0_101 = arith.constant 0 : index
    %159 = vector.load %arg1[%c20, %c0_100, %c0_101] : memref<64x8x1xf32, #tpu.memory_space<vmem>>, vector<1x8x1xf32>
    %160 = vector.shape_cast %159 : vector<1x8x1xf32> to vector<8x1xf32>
    %c20_102 = arith.constant 20 : index
    %c0_103 = arith.constant 0 : index
    %c0_104 = arith.constant 0 : index
    %161 = vector.load %arg0[%c20_102, %c0_103, %c0_104] : memref<64x1x128xf32, #tpu.memory_space<vmem>>, vector<1x1x128xf32>
    %162 = vector.shape_cast %161 : vector<1x1x128xf32> to vector<1x128xf32>
    %163 = vector.broadcast %160 : vector<8x1xf32> to vector<8x128xf32>
    %164 = vector.broadcast %162 : vector<1x128xf32> to vector<8x128xf32>
    %165 = arith.mulf %163, %164 : vector<8x128xf32>
    %166 = arith.addf %158, %165 : vector<8x128xf32>
    %c21 = arith.constant 21 : index
    %c0_105 = arith.constant 0 : index
    %c0_106 = arith.constant 0 : index
    %167 = vector.load %arg1[%c21, %c0_105, %c0_106] : memref<64x8x1xf32, #tpu.memory_space<vmem>>, vector<1x8x1xf32>
    %168 = vector.shape_cast %167 : vector<1x8x1xf32> to vector<8x1xf32>
    %c21_107 = arith.constant 21 : index
    %c0_108 = arith.constant 0 : index
    %c0_109 = arith.constant 0 : index
    %169 = vector.load %arg0[%c21_107, %c0_108, %c0_109] : memref<64x1x128xf32, #tpu.memory_space<vmem>>, vector<1x1x128xf32>
    %170 = vector.shape_cast %169 : vector<1x1x128xf32> to vector<1x128xf32>
    %171 = vector.broadcast %168 : vector<8x1xf32> to vector<8x128xf32>
    %172 = vector.broadcast %170 : vector<1x128xf32> to vector<8x128xf32>
    %173 = arith.mulf %171, %172 : vector<8x128xf32>
    %174 = arith.addf %166, %173 : vector<8x128xf32>
    %c22 = arith.constant 22 : index
    %c0_110 = arith.constant 0 : index
    %c0_111 = arith.constant 0 : index
    %175 = vector.load %arg1[%c22, %c0_110, %c0_111] : memref<64x8x1xf32, #tpu.memory_space<vmem>>, vector<1x8x1xf32>
    %176 = vector.shape_cast %175 : vector<1x8x1xf32> to vector<8x1xf32>
    %c22_112 = arith.constant 22 : index
    %c0_113 = arith.constant 0 : index
    %c0_114 = arith.constant 0 : index
    %177 = vector.load %arg0[%c22_112, %c0_113, %c0_114] : memref<64x1x128xf32, #tpu.memory_space<vmem>>, vector<1x1x128xf32>
    %178 = vector.shape_cast %177 : vector<1x1x128xf32> to vector<1x128xf32>
    %179 = vector.broadcast %176 : vector<8x1xf32> to vector<8x128xf32>
    %180 = vector.broadcast %178 : vector<1x128xf32> to vector<8x128xf32>
    %181 = arith.mulf %179, %180 : vector<8x128xf32>
    %182 = arith.addf %174, %181 : vector<8x128xf32>
    %c23 = arith.constant 23 : index
    %c0_115 = arith.constant 0 : index
    %c0_116 = arith.constant 0 : index
    %183 = vector.load %arg1[%c23, %c0_115, %c0_116] : memref<64x8x1xf32, #tpu.memory_space<vmem>>, vector<1x8x1xf32>
    %184 = vector.shape_cast %183 : vector<1x8x1xf32> to vector<8x1xf32>
    %c23_117 = arith.constant 23 : index
    %c0_118 = arith.constant 0 : index
    %c0_119 = arith.constant 0 : index
    %185 = vector.load %arg0[%c23_117, %c0_118, %c0_119] : memref<64x1x128xf32, #tpu.memory_space<vmem>>, vector<1x1x128xf32>
    %186 = vector.shape_cast %185 : vector<1x1x128xf32> to vector<1x128xf32>
    %187 = vector.broadcast %184 : vector<8x1xf32> to vector<8x128xf32>
    %188 = vector.broadcast %186 : vector<1x128xf32> to vector<8x128xf32>
    %189 = arith.mulf %187, %188 : vector<8x128xf32>
    %190 = arith.addf %182, %189 : vector<8x128xf32>
    %c24 = arith.constant 24 : index
    %c0_120 = arith.constant 0 : index
    %c0_121 = arith.constant 0 : index
    %191 = vector.load %arg1[%c24, %c0_120, %c0_121] : memref<64x8x1xf32, #tpu.memory_space<vmem>>, vector<1x8x1xf32>
    %192 = vector.shape_cast %191 : vector<1x8x1xf32> to vector<8x1xf32>
    %c24_122 = arith.constant 24 : index
    %c0_123 = arith.constant 0 : index
    %c0_124 = arith.constant 0 : index
    %193 = vector.load %arg0[%c24_122, %c0_123, %c0_124] : memref<64x1x128xf32, #tpu.memory_space<vmem>>, vector<1x1x128xf32>
    %194 = vector.shape_cast %193 : vector<1x1x128xf32> to vector<1x128xf32>
    %195 = vector.broadcast %192 : vector<8x1xf32> to vector<8x128xf32>
    %196 = vector.broadcast %194 : vector<1x128xf32> to vector<8x128xf32>
    %197 = arith.mulf %195, %196 : vector<8x128xf32>
    %198 = arith.addf %190, %197 : vector<8x128xf32>
    %c25 = arith.constant 25 : index
    %c0_125 = arith.constant 0 : index
    %c0_126 = arith.constant 0 : index
    %199 = vector.load %arg1[%c25, %c0_125, %c0_126] : memref<64x8x1xf32, #tpu.memory_space<vmem>>, vector<1x8x1xf32>
    %200 = vector.shape_cast %199 : vector<1x8x1xf32> to vector<8x1xf32>
    %c25_127 = arith.constant 25 : index
    %c0_128 = arith.constant 0 : index
    %c0_129 = arith.constant 0 : index
    %201 = vector.load %arg0[%c25_127, %c0_128, %c0_129] : memref<64x1x128xf32, #tpu.memory_space<vmem>>, vector<1x1x128xf32>
    %202 = vector.shape_cast %201 : vector<1x1x128xf32> to vector<1x128xf32>
    %203 = vector.broadcast %200 : vector<8x1xf32> to vector<8x128xf32>
    %204 = vector.broadcast %202 : vector<1x128xf32> to vector<8x128xf32>
    %205 = arith.mulf %203, %204 : vector<8x128xf32>
    %206 = arith.addf %198, %205 : vector<8x128xf32>
    %c26 = arith.constant 26 : index
    %c0_130 = arith.constant 0 : index
    %c0_131 = arith.constant 0 : index
    %207 = vector.load %arg1[%c26, %c0_130, %c0_131] : memref<64x8x1xf32, #tpu.memory_space<vmem>>, vector<1x8x1xf32>
    %208 = vector.shape_cast %207 : vector<1x8x1xf32> to vector<8x1xf32>
    %c26_132 = arith.constant 26 : index
    %c0_133 = arith.constant 0 : index
    %c0_134 = arith.constant 0 : index
    %209 = vector.load %arg0[%c26_132, %c0_133, %c0_134] : memref<64x1x128xf32, #tpu.memory_space<vmem>>, vector<1x1x128xf32>
    %210 = vector.shape_cast %209 : vector<1x1x128xf32> to vector<1x128xf32>
    %211 = vector.broadcast %208 : vector<8x1xf32> to vector<8x128xf32>
    %212 = vector.broadcast %210 : vector<1x128xf32> to vector<8x128xf32>
    %213 = arith.mulf %211, %212 : vector<8x128xf32>
    %214 = arith.addf %206, %213 : vector<8x128xf32>
    %c27 = arith.constant 27 : index
    %c0_135 = arith.constant 0 : index
    %c0_136 = arith.constant 0 : index
    %215 = vector.load %arg1[%c27, %c0_135, %c0_136] : memref<64x8x1xf32, #tpu.memory_space<vmem>>, vector<1x8x1xf32>
    %216 = vector.shape_cast %215 : vector<1x8x1xf32> to vector<8x1xf32>
    %c27_137 = arith.constant 27 : index
    %c0_138 = arith.constant 0 : index
    %c0_139 = arith.constant 0 : index
    %217 = vector.load %arg0[%c27_137, %c0_138, %c0_139] : memref<64x1x128xf32, #tpu.memory_space<vmem>>, vector<1x1x128xf32>
    %218 = vector.shape_cast %217 : vector<1x1x128xf32> to vector<1x128xf32>
    %219 = vector.broadcast %216 : vector<8x1xf32> to vector<8x128xf32>
    %220 = vector.broadcast %218 : vector<1x128xf32> to vector<8x128xf32>
    %221 = arith.mulf %219, %220 : vector<8x128xf32>
    %222 = arith.addf %214, %221 : vector<8x128xf32>
    %c28 = arith.constant 28 : index
    %c0_140 = arith.constant 0 : index
    %c0_141 = arith.constant 0 : index
    %223 = vector.load %arg1[%c28, %c0_140, %c0_141] : memref<64x8x1xf32, #tpu.memory_space<vmem>>, vector<1x8x1xf32>
    %224 = vector.shape_cast %223 : vector<1x8x1xf32> to vector<8x1xf32>
    %c28_142 = arith.constant 28 : index
    %c0_143 = arith.constant 0 : index
    %c0_144 = arith.constant 0 : index
    %225 = vector.load %arg0[%c28_142, %c0_143, %c0_144] : memref<64x1x128xf32, #tpu.memory_space<vmem>>, vector<1x1x128xf32>
    %226 = vector.shape_cast %225 : vector<1x1x128xf32> to vector<1x128xf32>
    %227 = vector.broadcast %224 : vector<8x1xf32> to vector<8x128xf32>
    %228 = vector.broadcast %226 : vector<1x128xf32> to vector<8x128xf32>
    %229 = arith.mulf %227, %228 : vector<8x128xf32>
    %230 = arith.addf %222, %229 : vector<8x128xf32>
    %c29 = arith.constant 29 : index
    %c0_145 = arith.constant 0 : index
    %c0_146 = arith.constant 0 : index
    %231 = vector.load %arg1[%c29, %c0_145, %c0_146] : memref<64x8x1xf32, #tpu.memory_space<vmem>>, vector<1x8x1xf32>
    %232 = vector.shape_cast %231 : vector<1x8x1xf32> to vector<8x1xf32>
    %c29_147 = arith.constant 29 : index
    %c0_148 = arith.constant 0 : index
    %c0_149 = arith.constant 0 : index
    %233 = vector.load %arg0[%c29_147, %c0_148, %c0_149] : memref<64x1x128xf32, #tpu.memory_space<vmem>>, vector<1x1x128xf32>
    %234 = vector.shape_cast %233 : vector<1x1x128xf32> to vector<1x128xf32>
    %235 = vector.broadcast %232 : vector<8x1xf32> to vector<8x128xf32>
    %236 = vector.broadcast %234 : vector<1x128xf32> to vector<8x128xf32>
    %237 = arith.mulf %235, %236 : vector<8x128xf32>
    %238 = arith.addf %230, %237 : vector<8x128xf32>
    %c30 = arith.constant 30 : index
    %c0_150 = arith.constant 0 : index
    %c0_151 = arith.constant 0 : index
    %239 = vector.load %arg1[%c30, %c0_150, %c0_151] : memref<64x8x1xf32, #tpu.memory_space<vmem>>, vector<1x8x1xf32>
    %240 = vector.shape_cast %239 : vector<1x8x1xf32> to vector<8x1xf32>
    %c30_152 = arith.constant 30 : index
    %c0_153 = arith.constant 0 : index
    %c0_154 = arith.constant 0 : index
    %241 = vector.load %arg0[%c30_152, %c0_153, %c0_154] : memref<64x1x128xf32, #tpu.memory_space<vmem>>, vector<1x1x128xf32>
    %242 = vector.shape_cast %241 : vector<1x1x128xf32> to vector<1x128xf32>
    %243 = vector.broadcast %240 : vector<8x1xf32> to vector<8x128xf32>
    %244 = vector.broadcast %242 : vector<1x128xf32> to vector<8x128xf32>
    %245 = arith.mulf %243, %244 : vector<8x128xf32>
    %246 = arith.addf %238, %245 : vector<8x128xf32>
    %c31 = arith.constant 31 : index
    %c0_155 = arith.constant 0 : index
    %c0_156 = arith.constant 0 : index
    %247 = vector.load %arg1[%c31, %c0_155, %c0_156] : memref<64x8x1xf32, #tpu.memory_space<vmem>>, vector<1x8x1xf32>
    %248 = vector.shape_cast %247 : vector<1x8x1xf32> to vector<8x1xf32>
    %c31_157 = arith.constant 31 : index
    %c0_158 = arith.constant 0 : index
    %c0_159 = arith.constant 0 : index
    %249 = vector.load %arg0[%c31_157, %c0_158, %c0_159] : memref<64x1x128xf32, #tpu.memory_space<vmem>>, vector<1x1x128xf32>
    %250 = vector.shape_cast %249 : vector<1x1x128xf32> to vector<1x128xf32>
    %251 = vector.broadcast %248 : vector<8x1xf32> to vector<8x128xf32>
    %252 = vector.broadcast %250 : vector<1x128xf32> to vector<8x128xf32>
    %253 = arith.mulf %251, %252 : vector<8x128xf32>
    %254 = arith.addf %246, %253 : vector<8x128xf32>
    %c32 = arith.constant 32 : index
    %c0_160 = arith.constant 0 : index
    %c0_161 = arith.constant 0 : index
    %255 = vector.load %arg1[%c32, %c0_160, %c0_161] : memref<64x8x1xf32, #tpu.memory_space<vmem>>, vector<1x8x1xf32>
    %256 = vector.shape_cast %255 : vector<1x8x1xf32> to vector<8x1xf32>
    %c32_162 = arith.constant 32 : index
    %c0_163 = arith.constant 0 : index
    %c0_164 = arith.constant 0 : index
    %257 = vector.load %arg0[%c32_162, %c0_163, %c0_164] : memref<64x1x128xf32, #tpu.memory_space<vmem>>, vector<1x1x128xf32>
    %258 = vector.shape_cast %257 : vector<1x1x128xf32> to vector<1x128xf32>
    %259 = vector.broadcast %256 : vector<8x1xf32> to vector<8x128xf32>
    %260 = vector.broadcast %258 : vector<1x128xf32> to vector<8x128xf32>
    %261 = arith.mulf %259, %260 : vector<8x128xf32>
    %262 = arith.addf %254, %261 : vector<8x128xf32>
    %c33 = arith.constant 33 : index
    %c0_165 = arith.constant 0 : index
    %c0_166 = arith.constant 0 : index
    %263 = vector.load %arg1[%c33, %c0_165, %c0_166] : memref<64x8x1xf32, #tpu.memory_space<vmem>>, vector<1x8x1xf32>
    %264 = vector.shape_cast %263 : vector<1x8x1xf32> to vector<8x1xf32>
    %c33_167 = arith.constant 33 : index
    %c0_168 = arith.constant 0 : index
    %c0_169 = arith.constant 0 : index
    %265 = vector.load %arg0[%c33_167, %c0_168, %c0_169] : memref<64x1x128xf32, #tpu.memory_space<vmem>>, vector<1x1x128xf32>
    %266 = vector.shape_cast %265 : vector<1x1x128xf32> to vector<1x128xf32>
    %267 = vector.broadcast %264 : vector<8x1xf32> to vector<8x128xf32>
    %268 = vector.broadcast %266 : vector<1x128xf32> to vector<8x128xf32>
    %269 = arith.mulf %267, %268 : vector<8x128xf32>
    %270 = arith.addf %262, %269 : vector<8x128xf32>
    %c34 = arith.constant 34 : index
    %c0_170 = arith.constant 0 : index
    %c0_171 = arith.constant 0 : index
    %271 = vector.load %arg1[%c34, %c0_170, %c0_171] : memref<64x8x1xf32, #tpu.memory_space<vmem>>, vector<1x8x1xf32>
    %272 = vector.shape_cast %271 : vector<1x8x1xf32> to vector<8x1xf32>
    %c34_172 = arith.constant 34 : index
    %c0_173 = arith.constant 0 : index
    %c0_174 = arith.constant 0 : index
    %273 = vector.load %arg0[%c34_172, %c0_173, %c0_174] : memref<64x1x128xf32, #tpu.memory_space<vmem>>, vector<1x1x128xf32>
    %274 = vector.shape_cast %273 : vector<1x1x128xf32> to vector<1x128xf32>
    %275 = vector.broadcast %272 : vector<8x1xf32> to vector<8x128xf32>
    %276 = vector.broadcast %274 : vector<1x128xf32> to vector<8x128xf32>
    %277 = arith.mulf %275, %276 : vector<8x128xf32>
    %278 = arith.addf %270, %277 : vector<8x128xf32>
    %c35 = arith.constant 35 : index
    %c0_175 = arith.constant 0 : index
    %c0_176 = arith.constant 0 : index
    %279 = vector.load %arg1[%c35, %c0_175, %c0_176] : memref<64x8x1xf32, #tpu.memory_space<vmem>>, vector<1x8x1xf32>
    %280 = vector.shape_cast %279 : vector<1x8x1xf32> to vector<8x1xf32>
    %c35_177 = arith.constant 35 : index
    %c0_178 = arith.constant 0 : index
    %c0_179 = arith.constant 0 : index
    %281 = vector.load %arg0[%c35_177, %c0_178, %c0_179] : memref<64x1x128xf32, #tpu.memory_space<vmem>>, vector<1x1x128xf32>
    %282 = vector.shape_cast %281 : vector<1x1x128xf32> to vector<1x128xf32>
    %283 = vector.broadcast %280 : vector<8x1xf32> to vector<8x128xf32>
    %284 = vector.broadcast %282 : vector<1x128xf32> to vector<8x128xf32>
    %285 = arith.mulf %283, %284 : vector<8x128xf32>
    %286 = arith.addf %278, %285 : vector<8x128xf32>
    %c36 = arith.constant 36 : index
    %c0_180 = arith.constant 0 : index
    %c0_181 = arith.constant 0 : index
    %287 = vector.load %arg1[%c36, %c0_180, %c0_181] : memref<64x8x1xf32, #tpu.memory_space<vmem>>, vector<1x8x1xf32>
    %288 = vector.shape_cast %287 : vector<1x8x1xf32> to vector<8x1xf32>
    %c36_182 = arith.constant 36 : index
    %c0_183 = arith.constant 0 : index
    %c0_184 = arith.constant 0 : index
    %289 = vector.load %arg0[%c36_182, %c0_183, %c0_184] : memref<64x1x128xf32, #tpu.memory_space<vmem>>, vector<1x1x128xf32>
    %290 = vector.shape_cast %289 : vector<1x1x128xf32> to vector<1x128xf32>
    %291 = vector.broadcast %288 : vector<8x1xf32> to vector<8x128xf32>
    %292 = vector.broadcast %290 : vector<1x128xf32> to vector<8x128xf32>
    %293 = arith.mulf %291, %292 : vector<8x128xf32>
    %294 = arith.addf %286, %293 : vector<8x128xf32>
    %c37 = arith.constant 37 : index
    %c0_185 = arith.constant 0 : index
    %c0_186 = arith.constant 0 : index
    %295 = vector.load %arg1[%c37, %c0_185, %c0_186] : memref<64x8x1xf32, #tpu.memory_space<vmem>>, vector<1x8x1xf32>
    %296 = vector.shape_cast %295 : vector<1x8x1xf32> to vector<8x1xf32>
    %c37_187 = arith.constant 37 : index
    %c0_188 = arith.constant 0 : index
    %c0_189 = arith.constant 0 : index
    %297 = vector.load %arg0[%c37_187, %c0_188, %c0_189] : memref<64x1x128xf32, #tpu.memory_space<vmem>>, vector<1x1x128xf32>
    %298 = vector.shape_cast %297 : vector<1x1x128xf32> to vector<1x128xf32>
    %299 = vector.broadcast %296 : vector<8x1xf32> to vector<8x128xf32>
    %300 = vector.broadcast %298 : vector<1x128xf32> to vector<8x128xf32>
    %301 = arith.mulf %299, %300 : vector<8x128xf32>
    %302 = arith.addf %294, %301 : vector<8x128xf32>
    %c38 = arith.constant 38 : index
    %c0_190 = arith.constant 0 : index
    %c0_191 = arith.constant 0 : index
    %303 = vector.load %arg1[%c38, %c0_190, %c0_191] : memref<64x8x1xf32, #tpu.memory_space<vmem>>, vector<1x8x1xf32>
    %304 = vector.shape_cast %303 : vector<1x8x1xf32> to vector<8x1xf32>
    %c38_192 = arith.constant 38 : index
    %c0_193 = arith.constant 0 : index
    %c0_194 = arith.constant 0 : index
    %305 = vector.load %arg0[%c38_192, %c0_193, %c0_194] : memref<64x1x128xf32, #tpu.memory_space<vmem>>, vector<1x1x128xf32>
    %306 = vector.shape_cast %305 : vector<1x1x128xf32> to vector<1x128xf32>
    %307 = vector.broadcast %304 : vector<8x1xf32> to vector<8x128xf32>
    %308 = vector.broadcast %306 : vector<1x128xf32> to vector<8x128xf32>
    %309 = arith.mulf %307, %308 : vector<8x128xf32>
    %310 = arith.addf %302, %309 : vector<8x128xf32>
    %c39 = arith.constant 39 : index
    %c0_195 = arith.constant 0 : index
    %c0_196 = arith.constant 0 : index
    %311 = vector.load %arg1[%c39, %c0_195, %c0_196] : memref<64x8x1xf32, #tpu.memory_space<vmem>>, vector<1x8x1xf32>
    %312 = vector.shape_cast %311 : vector<1x8x1xf32> to vector<8x1xf32>
    %c39_197 = arith.constant 39 : index
    %c0_198 = arith.constant 0 : index
    %c0_199 = arith.constant 0 : index
    %313 = vector.load %arg0[%c39_197, %c0_198, %c0_199] : memref<64x1x128xf32, #tpu.memory_space<vmem>>, vector<1x1x128xf32>
    %314 = vector.shape_cast %313 : vector<1x1x128xf32> to vector<1x128xf32>
    %315 = vector.broadcast %312 : vector<8x1xf32> to vector<8x128xf32>
    %316 = vector.broadcast %314 : vector<1x128xf32> to vector<8x128xf32>
    %317 = arith.mulf %315, %316 : vector<8x128xf32>
    %318 = arith.addf %310, %317 : vector<8x128xf32>
    %c40 = arith.constant 40 : index
    %c0_200 = arith.constant 0 : index
    %c0_201 = arith.constant 0 : index
    %319 = vector.load %arg1[%c40, %c0_200, %c0_201] : memref<64x8x1xf32, #tpu.memory_space<vmem>>, vector<1x8x1xf32>
    %320 = vector.shape_cast %319 : vector<1x8x1xf32> to vector<8x1xf32>
    %c40_202 = arith.constant 40 : index
    %c0_203 = arith.constant 0 : index
    %c0_204 = arith.constant 0 : index
    %321 = vector.load %arg0[%c40_202, %c0_203, %c0_204] : memref<64x1x128xf32, #tpu.memory_space<vmem>>, vector<1x1x128xf32>
    %322 = vector.shape_cast %321 : vector<1x1x128xf32> to vector<1x128xf32>
    %323 = vector.broadcast %320 : vector<8x1xf32> to vector<8x128xf32>
    %324 = vector.broadcast %322 : vector<1x128xf32> to vector<8x128xf32>
    %325 = arith.mulf %323, %324 : vector<8x128xf32>
    %326 = arith.addf %318, %325 : vector<8x128xf32>
    %c41 = arith.constant 41 : index
    %c0_205 = arith.constant 0 : index
    %c0_206 = arith.constant 0 : index
    %327 = vector.load %arg1[%c41, %c0_205, %c0_206] : memref<64x8x1xf32, #tpu.memory_space<vmem>>, vector<1x8x1xf32>
    %328 = vector.shape_cast %327 : vector<1x8x1xf32> to vector<8x1xf32>
    %c41_207 = arith.constant 41 : index
    %c0_208 = arith.constant 0 : index
    %c0_209 = arith.constant 0 : index
    %329 = vector.load %arg0[%c41_207, %c0_208, %c0_209] : memref<64x1x128xf32, #tpu.memory_space<vmem>>, vector<1x1x128xf32>
    %330 = vector.shape_cast %329 : vector<1x1x128xf32> to vector<1x128xf32>
    %331 = vector.broadcast %328 : vector<8x1xf32> to vector<8x128xf32>
    %332 = vector.broadcast %330 : vector<1x128xf32> to vector<8x128xf32>
    %333 = arith.mulf %331, %332 : vector<8x128xf32>
    %334 = arith.addf %326, %333 : vector<8x128xf32>
    %c42 = arith.constant 42 : index
    %c0_210 = arith.constant 0 : index
    %c0_211 = arith.constant 0 : index
    %335 = vector.load %arg1[%c42, %c0_210, %c0_211] : memref<64x8x1xf32, #tpu.memory_space<vmem>>, vector<1x8x1xf32>
    %336 = vector.shape_cast %335 : vector<1x8x1xf32> to vector<8x1xf32>
    %c42_212 = arith.constant 42 : index
    %c0_213 = arith.constant 0 : index
    %c0_214 = arith.constant 0 : index
    %337 = vector.load %arg0[%c42_212, %c0_213, %c0_214] : memref<64x1x128xf32, #tpu.memory_space<vmem>>, vector<1x1x128xf32>
    %338 = vector.shape_cast %337 : vector<1x1x128xf32> to vector<1x128xf32>
    %339 = vector.broadcast %336 : vector<8x1xf32> to vector<8x128xf32>
    %340 = vector.broadcast %338 : vector<1x128xf32> to vector<8x128xf32>
    %341 = arith.mulf %339, %340 : vector<8x128xf32>
    %342 = arith.addf %334, %341 : vector<8x128xf32>
    %c43 = arith.constant 43 : index
    %c0_215 = arith.constant 0 : index
    %c0_216 = arith.constant 0 : index
    %343 = vector.load %arg1[%c43, %c0_215, %c0_216] : memref<64x8x1xf32, #tpu.memory_space<vmem>>, vector<1x8x1xf32>
    %344 = vector.shape_cast %343 : vector<1x8x1xf32> to vector<8x1xf32>
    %c43_217 = arith.constant 43 : index
    %c0_218 = arith.constant 0 : index
    %c0_219 = arith.constant 0 : index
    %345 = vector.load %arg0[%c43_217, %c0_218, %c0_219] : memref<64x1x128xf32, #tpu.memory_space<vmem>>, vector<1x1x128xf32>
    %346 = vector.shape_cast %345 : vector<1x1x128xf32> to vector<1x128xf32>
    %347 = vector.broadcast %344 : vector<8x1xf32> to vector<8x128xf32>
    %348 = vector.broadcast %346 : vector<1x128xf32> to vector<8x128xf32>
    %349 = arith.mulf %347, %348 : vector<8x128xf32>
    %350 = arith.addf %342, %349 : vector<8x128xf32>
    %c44 = arith.constant 44 : index
    %c0_220 = arith.constant 0 : index
    %c0_221 = arith.constant 0 : index
    %351 = vector.load %arg1[%c44, %c0_220, %c0_221] : memref<64x8x1xf32, #tpu.memory_space<vmem>>, vector<1x8x1xf32>
    %352 = vector.shape_cast %351 : vector<1x8x1xf32> to vector<8x1xf32>
    %c44_222 = arith.constant 44 : index
    %c0_223 = arith.constant 0 : index
    %c0_224 = arith.constant 0 : index
    %353 = vector.load %arg0[%c44_222, %c0_223, %c0_224] : memref<64x1x128xf32, #tpu.memory_space<vmem>>, vector<1x1x128xf32>
    %354 = vector.shape_cast %353 : vector<1x1x128xf32> to vector<1x128xf32>
    %355 = vector.broadcast %352 : vector<8x1xf32> to vector<8x128xf32>
    %356 = vector.broadcast %354 : vector<1x128xf32> to vector<8x128xf32>
    %357 = arith.mulf %355, %356 : vector<8x128xf32>
    %358 = arith.addf %350, %357 : vector<8x128xf32>
    %c45 = arith.constant 45 : index
    %c0_225 = arith.constant 0 : index
    %c0_226 = arith.constant 0 : index
    %359 = vector.load %arg1[%c45, %c0_225, %c0_226] : memref<64x8x1xf32, #tpu.memory_space<vmem>>, vector<1x8x1xf32>
    %360 = vector.shape_cast %359 : vector<1x8x1xf32> to vector<8x1xf32>
    %c45_227 = arith.constant 45 : index
    %c0_228 = arith.constant 0 : index
    %c0_229 = arith.constant 0 : index
    %361 = vector.load %arg0[%c45_227, %c0_228, %c0_229] : memref<64x1x128xf32, #tpu.memory_space<vmem>>, vector<1x1x128xf32>
    %362 = vector.shape_cast %361 : vector<1x1x128xf32> to vector<1x128xf32>
    %363 = vector.broadcast %360 : vector<8x1xf32> to vector<8x128xf32>
    %364 = vector.broadcast %362 : vector<1x128xf32> to vector<8x128xf32>
    %365 = arith.mulf %363, %364 : vector<8x128xf32>
    %366 = arith.addf %358, %365 : vector<8x128xf32>
    %c46 = arith.constant 46 : index
    %c0_230 = arith.constant 0 : index
    %c0_231 = arith.constant 0 : index
    %367 = vector.load %arg1[%c46, %c0_230, %c0_231] : memref<64x8x1xf32, #tpu.memory_space<vmem>>, vector<1x8x1xf32>
    %368 = vector.shape_cast %367 : vector<1x8x1xf32> to vector<8x1xf32>
    %c46_232 = arith.constant 46 : index
    %c0_233 = arith.constant 0 : index
    %c0_234 = arith.constant 0 : index
    %369 = vector.load %arg0[%c46_232, %c0_233, %c0_234] : memref<64x1x128xf32, #tpu.memory_space<vmem>>, vector<1x1x128xf32>
    %370 = vector.shape_cast %369 : vector<1x1x128xf32> to vector<1x128xf32>
    %371 = vector.broadcast %368 : vector<8x1xf32> to vector<8x128xf32>
    %372 = vector.broadcast %370 : vector<1x128xf32> to vector<8x128xf32>
    %373 = arith.mulf %371, %372 : vector<8x128xf32>
    %374 = arith.addf %366, %373 : vector<8x128xf32>
    %c47 = arith.constant 47 : index
    %c0_235 = arith.constant 0 : index
    %c0_236 = arith.constant 0 : index
    %375 = vector.load %arg1[%c47, %c0_235, %c0_236] : memref<64x8x1xf32, #tpu.memory_space<vmem>>, vector<1x8x1xf32>
    %376 = vector.shape_cast %375 : vector<1x8x1xf32> to vector<8x1xf32>
    %c47_237 = arith.constant 47 : index
    %c0_238 = arith.constant 0 : index
    %c0_239 = arith.constant 0 : index
    %377 = vector.load %arg0[%c47_237, %c0_238, %c0_239] : memref<64x1x128xf32, #tpu.memory_space<vmem>>, vector<1x1x128xf32>
    %378 = vector.shape_cast %377 : vector<1x1x128xf32> to vector<1x128xf32>
    %379 = vector.broadcast %376 : vector<8x1xf32> to vector<8x128xf32>
    %380 = vector.broadcast %378 : vector<1x128xf32> to vector<8x128xf32>
    %381 = arith.mulf %379, %380 : vector<8x128xf32>
    %382 = arith.addf %374, %381 : vector<8x128xf32>
    %c48 = arith.constant 48 : index
    %c0_240 = arith.constant 0 : index
    %c0_241 = arith.constant 0 : index
    %383 = vector.load %arg1[%c48, %c0_240, %c0_241] : memref<64x8x1xf32, #tpu.memory_space<vmem>>, vector<1x8x1xf32>
    %384 = vector.shape_cast %383 : vector<1x8x1xf32> to vector<8x1xf32>
    %c48_242 = arith.constant 48 : index
    %c0_243 = arith.constant 0 : index
    %c0_244 = arith.constant 0 : index
    %385 = vector.load %arg0[%c48_242, %c0_243, %c0_244] : memref<64x1x128xf32, #tpu.memory_space<vmem>>, vector<1x1x128xf32>
    %386 = vector.shape_cast %385 : vector<1x1x128xf32> to vector<1x128xf32>
    %387 = vector.broadcast %384 : vector<8x1xf32> to vector<8x128xf32>
    %388 = vector.broadcast %386 : vector<1x128xf32> to vector<8x128xf32>
    %389 = arith.mulf %387, %388 : vector<8x128xf32>
    %390 = arith.addf %382, %389 : vector<8x128xf32>
    %c49 = arith.constant 49 : index
    %c0_245 = arith.constant 0 : index
    %c0_246 = arith.constant 0 : index
    %391 = vector.load %arg1[%c49, %c0_245, %c0_246] : memref<64x8x1xf32, #tpu.memory_space<vmem>>, vector<1x8x1xf32>
    %392 = vector.shape_cast %391 : vector<1x8x1xf32> to vector<8x1xf32>
    %c49_247 = arith.constant 49 : index
    %c0_248 = arith.constant 0 : index
    %c0_249 = arith.constant 0 : index
    %393 = vector.load %arg0[%c49_247, %c0_248, %c0_249] : memref<64x1x128xf32, #tpu.memory_space<vmem>>, vector<1x1x128xf32>
    %394 = vector.shape_cast %393 : vector<1x1x128xf32> to vector<1x128xf32>
    %395 = vector.broadcast %392 : vector<8x1xf32> to vector<8x128xf32>
    %396 = vector.broadcast %394 : vector<1x128xf32> to vector<8x128xf32>
    %397 = arith.mulf %395, %396 : vector<8x128xf32>
    %398 = arith.addf %390, %397 : vector<8x128xf32>
    %c50 = arith.constant 50 : index
    %c0_250 = arith.constant 0 : index
    %c0_251 = arith.constant 0 : index
    %399 = vector.load %arg1[%c50, %c0_250, %c0_251] : memref<64x8x1xf32, #tpu.memory_space<vmem>>, vector<1x8x1xf32>
    %400 = vector.shape_cast %399 : vector<1x8x1xf32> to vector<8x1xf32>
    %c50_252 = arith.constant 50 : index
    %c0_253 = arith.constant 0 : index
    %c0_254 = arith.constant 0 : index
    %401 = vector.load %arg0[%c50_252, %c0_253, %c0_254] : memref<64x1x128xf32, #tpu.memory_space<vmem>>, vector<1x1x128xf32>
    %402 = vector.shape_cast %401 : vector<1x1x128xf32> to vector<1x128xf32>
    %403 = vector.broadcast %400 : vector<8x1xf32> to vector<8x128xf32>
    %404 = vector.broadcast %402 : vector<1x128xf32> to vector<8x128xf32>
    %405 = arith.mulf %403, %404 : vector<8x128xf32>
    %406 = arith.addf %398, %405 : vector<8x128xf32>
    %c51 = arith.constant 51 : index
    %c0_255 = arith.constant 0 : index
    %c0_256 = arith.constant 0 : index
    %407 = vector.load %arg1[%c51, %c0_255, %c0_256] : memref<64x8x1xf32, #tpu.memory_space<vmem>>, vector<1x8x1xf32>
    %408 = vector.shape_cast %407 : vector<1x8x1xf32> to vector<8x1xf32>
    %c51_257 = arith.constant 51 : index
    %c0_258 = arith.constant 0 : index
    %c0_259 = arith.constant 0 : index
    %409 = vector.load %arg0[%c51_257, %c0_258, %c0_259] : memref<64x1x128xf32, #tpu.memory_space<vmem>>, vector<1x1x128xf32>
    %410 = vector.shape_cast %409 : vector<1x1x128xf32> to vector<1x128xf32>
    %411 = vector.broadcast %408 : vector<8x1xf32> to vector<8x128xf32>
    %412 = vector.broadcast %410 : vector<1x128xf32> to vector<8x128xf32>
    %413 = arith.mulf %411, %412 : vector<8x128xf32>
    %414 = arith.addf %406, %413 : vector<8x128xf32>
    %c52 = arith.constant 52 : index
    %c0_260 = arith.constant 0 : index
    %c0_261 = arith.constant 0 : index
    %415 = vector.load %arg1[%c52, %c0_260, %c0_261] : memref<64x8x1xf32, #tpu.memory_space<vmem>>, vector<1x8x1xf32>
    %416 = vector.shape_cast %415 : vector<1x8x1xf32> to vector<8x1xf32>
    %c52_262 = arith.constant 52 : index
    %c0_263 = arith.constant 0 : index
    %c0_264 = arith.constant 0 : index
    %417 = vector.load %arg0[%c52_262, %c0_263, %c0_264] : memref<64x1x128xf32, #tpu.memory_space<vmem>>, vector<1x1x128xf32>
    %418 = vector.shape_cast %417 : vector<1x1x128xf32> to vector<1x128xf32>
    %419 = vector.broadcast %416 : vector<8x1xf32> to vector<8x128xf32>
    %420 = vector.broadcast %418 : vector<1x128xf32> to vector<8x128xf32>
    %421 = arith.mulf %419, %420 : vector<8x128xf32>
    %422 = arith.addf %414, %421 : vector<8x128xf32>
    %c53 = arith.constant 53 : index
    %c0_265 = arith.constant 0 : index
    %c0_266 = arith.constant 0 : index
    %423 = vector.load %arg1[%c53, %c0_265, %c0_266] : memref<64x8x1xf32, #tpu.memory_space<vmem>>, vector<1x8x1xf32>
    %424 = vector.shape_cast %423 : vector<1x8x1xf32> to vector<8x1xf32>
    %c53_267 = arith.constant 53 : index
    %c0_268 = arith.constant 0 : index
    %c0_269 = arith.constant 0 : index
    %425 = vector.load %arg0[%c53_267, %c0_268, %c0_269] : memref<64x1x128xf32, #tpu.memory_space<vmem>>, vector<1x1x128xf32>
    %426 = vector.shape_cast %425 : vector<1x1x128xf32> to vector<1x128xf32>
    %427 = vector.broadcast %424 : vector<8x1xf32> to vector<8x128xf32>
    %428 = vector.broadcast %426 : vector<1x128xf32> to vector<8x128xf32>
    %429 = arith.mulf %427, %428 : vector<8x128xf32>
    %430 = arith.addf %422, %429 : vector<8x128xf32>
    %c54 = arith.constant 54 : index
    %c0_270 = arith.constant 0 : index
    %c0_271 = arith.constant 0 : index
    %431 = vector.load %arg1[%c54, %c0_270, %c0_271] : memref<64x8x1xf32, #tpu.memory_space<vmem>>, vector<1x8x1xf32>
    %432 = vector.shape_cast %431 : vector<1x8x1xf32> to vector<8x1xf32>
    %c54_272 = arith.constant 54 : index
    %c0_273 = arith.constant 0 : index
    %c0_274 = arith.constant 0 : index
    %433 = vector.load %arg0[%c54_272, %c0_273, %c0_274] : memref<64x1x128xf32, #tpu.memory_space<vmem>>, vector<1x1x128xf32>
    %434 = vector.shape_cast %433 : vector<1x1x128xf32> to vector<1x128xf32>
    %435 = vector.broadcast %432 : vector<8x1xf32> to vector<8x128xf32>
    %436 = vector.broadcast %434 : vector<1x128xf32> to vector<8x128xf32>
    %437 = arith.mulf %435, %436 : vector<8x128xf32>
    %438 = arith.addf %430, %437 : vector<8x128xf32>
    %c55 = arith.constant 55 : index
    %c0_275 = arith.constant 0 : index
    %c0_276 = arith.constant 0 : index
    %439 = vector.load %arg1[%c55, %c0_275, %c0_276] : memref<64x8x1xf32, #tpu.memory_space<vmem>>, vector<1x8x1xf32>
    %440 = vector.shape_cast %439 : vector<1x8x1xf32> to vector<8x1xf32>
    %c55_277 = arith.constant 55 : index
    %c0_278 = arith.constant 0 : index
    %c0_279 = arith.constant 0 : index
    %441 = vector.load %arg0[%c55_277, %c0_278, %c0_279] : memref<64x1x128xf32, #tpu.memory_space<vmem>>, vector<1x1x128xf32>
    %442 = vector.shape_cast %441 : vector<1x1x128xf32> to vector<1x128xf32>
    %443 = vector.broadcast %440 : vector<8x1xf32> to vector<8x128xf32>
    %444 = vector.broadcast %442 : vector<1x128xf32> to vector<8x128xf32>
    %445 = arith.mulf %443, %444 : vector<8x128xf32>
    %446 = arith.addf %438, %445 : vector<8x128xf32>
    %c56 = arith.constant 56 : index
    %c0_280 = arith.constant 0 : index
    %c0_281 = arith.constant 0 : index
    %447 = vector.load %arg1[%c56, %c0_280, %c0_281] : memref<64x8x1xf32, #tpu.memory_space<vmem>>, vector<1x8x1xf32>
    %448 = vector.shape_cast %447 : vector<1x8x1xf32> to vector<8x1xf32>
    %c56_282 = arith.constant 56 : index
    %c0_283 = arith.constant 0 : index
    %c0_284 = arith.constant 0 : index
    %449 = vector.load %arg0[%c56_282, %c0_283, %c0_284] : memref<64x1x128xf32, #tpu.memory_space<vmem>>, vector<1x1x128xf32>
    %450 = vector.shape_cast %449 : vector<1x1x128xf32> to vector<1x128xf32>
    %451 = vector.broadcast %448 : vector<8x1xf32> to vector<8x128xf32>
    %452 = vector.broadcast %450 : vector<1x128xf32> to vector<8x128xf32>
    %453 = arith.mulf %451, %452 : vector<8x128xf32>
    %454 = arith.addf %446, %453 : vector<8x128xf32>
    %c57 = arith.constant 57 : index
    %c0_285 = arith.constant 0 : index
    %c0_286 = arith.constant 0 : index
    %455 = vector.load %arg1[%c57, %c0_285, %c0_286] : memref<64x8x1xf32, #tpu.memory_space<vmem>>, vector<1x8x1xf32>
    %456 = vector.shape_cast %455 : vector<1x8x1xf32> to vector<8x1xf32>
    %c57_287 = arith.constant 57 : index
    %c0_288 = arith.constant 0 : index
    %c0_289 = arith.constant 0 : index
    %457 = vector.load %arg0[%c57_287, %c0_288, %c0_289] : memref<64x1x128xf32, #tpu.memory_space<vmem>>, vector<1x1x128xf32>
    %458 = vector.shape_cast %457 : vector<1x1x128xf32> to vector<1x128xf32>
    %459 = vector.broadcast %456 : vector<8x1xf32> to vector<8x128xf32>
    %460 = vector.broadcast %458 : vector<1x128xf32> to vector<8x128xf32>
    %461 = arith.mulf %459, %460 : vector<8x128xf32>
    %462 = arith.addf %454, %461 : vector<8x128xf32>
    %c58 = arith.constant 58 : index
    %c0_290 = arith.constant 0 : index
    %c0_291 = arith.constant 0 : index
    %463 = vector.load %arg1[%c58, %c0_290, %c0_291] : memref<64x8x1xf32, #tpu.memory_space<vmem>>, vector<1x8x1xf32>
    %464 = vector.shape_cast %463 : vector<1x8x1xf32> to vector<8x1xf32>
    %c58_292 = arith.constant 58 : index
    %c0_293 = arith.constant 0 : index
    %c0_294 = arith.constant 0 : index
    %465 = vector.load %arg0[%c58_292, %c0_293, %c0_294] : memref<64x1x128xf32, #tpu.memory_space<vmem>>, vector<1x1x128xf32>
    %466 = vector.shape_cast %465 : vector<1x1x128xf32> to vector<1x128xf32>
    %467 = vector.broadcast %464 : vector<8x1xf32> to vector<8x128xf32>
    %468 = vector.broadcast %466 : vector<1x128xf32> to vector<8x128xf32>
    %469 = arith.mulf %467, %468 : vector<8x128xf32>
    %470 = arith.addf %462, %469 : vector<8x128xf32>
    %c59 = arith.constant 59 : index
    %c0_295 = arith.constant 0 : index
    %c0_296 = arith.constant 0 : index
    %471 = vector.load %arg1[%c59, %c0_295, %c0_296] : memref<64x8x1xf32, #tpu.memory_space<vmem>>, vector<1x8x1xf32>
    %472 = vector.shape_cast %471 : vector<1x8x1xf32> to vector<8x1xf32>
    %c59_297 = arith.constant 59 : index
    %c0_298 = arith.constant 0 : index
    %c0_299 = arith.constant 0 : index
    %473 = vector.load %arg0[%c59_297, %c0_298, %c0_299] : memref<64x1x128xf32, #tpu.memory_space<vmem>>, vector<1x1x128xf32>
    %474 = vector.shape_cast %473 : vector<1x1x128xf32> to vector<1x128xf32>
    %475 = vector.broadcast %472 : vector<8x1xf32> to vector<8x128xf32>
    %476 = vector.broadcast %474 : vector<1x128xf32> to vector<8x128xf32>
    %477 = arith.mulf %475, %476 : vector<8x128xf32>
    %478 = arith.addf %470, %477 : vector<8x128xf32>
    %c60 = arith.constant 60 : index
    %c0_300 = arith.constant 0 : index
    %c0_301 = arith.constant 0 : index
    %479 = vector.load %arg1[%c60, %c0_300, %c0_301] : memref<64x8x1xf32, #tpu.memory_space<vmem>>, vector<1x8x1xf32>
    %480 = vector.shape_cast %479 : vector<1x8x1xf32> to vector<8x1xf32>
    %c60_302 = arith.constant 60 : index
    %c0_303 = arith.constant 0 : index
    %c0_304 = arith.constant 0 : index
    %481 = vector.load %arg0[%c60_302, %c0_303, %c0_304] : memref<64x1x128xf32, #tpu.memory_space<vmem>>, vector<1x1x128xf32>
    %482 = vector.shape_cast %481 : vector<1x1x128xf32> to vector<1x128xf32>
    %483 = vector.broadcast %480 : vector<8x1xf32> to vector<8x128xf32>
    %484 = vector.broadcast %482 : vector<1x128xf32> to vector<8x128xf32>
    %485 = arith.mulf %483, %484 : vector<8x128xf32>
    %486 = arith.addf %478, %485 : vector<8x128xf32>
    %c61 = arith.constant 61 : index
    %c0_305 = arith.constant 0 : index
    %c0_306 = arith.constant 0 : index
    %487 = vector.load %arg1[%c61, %c0_305, %c0_306] : memref<64x8x1xf32, #tpu.memory_space<vmem>>, vector<1x8x1xf32>
    %488 = vector.shape_cast %487 : vector<1x8x1xf32> to vector<8x1xf32>
    %c61_307 = arith.constant 61 : index
    %c0_308 = arith.constant 0 : index
    %c0_309 = arith.constant 0 : index
    %489 = vector.load %arg0[%c61_307, %c0_308, %c0_309] : memref<64x1x128xf32, #tpu.memory_space<vmem>>, vector<1x1x128xf32>
    %490 = vector.shape_cast %489 : vector<1x1x128xf32> to vector<1x128xf32>
    %491 = vector.broadcast %488 : vector<8x1xf32> to vector<8x128xf32>
    %492 = vector.broadcast %490 : vector<1x128xf32> to vector<8x128xf32>
    %493 = arith.mulf %491, %492 : vector<8x128xf32>
    %494 = arith.addf %486, %493 : vector<8x128xf32>
    %c62 = arith.constant 62 : index
    %c0_310 = arith.constant 0 : index
    %c0_311 = arith.constant 0 : index
    %495 = vector.load %arg1[%c62, %c0_310, %c0_311] : memref<64x8x1xf32, #tpu.memory_space<vmem>>, vector<1x8x1xf32>
    %496 = vector.shape_cast %495 : vector<1x8x1xf32> to vector<8x1xf32>
    %c62_312 = arith.constant 62 : index
    %c0_313 = arith.constant 0 : index
    %c0_314 = arith.constant 0 : index
    %497 = vector.load %arg0[%c62_312, %c0_313, %c0_314] : memref<64x1x128xf32, #tpu.memory_space<vmem>>, vector<1x1x128xf32>
    %498 = vector.shape_cast %497 : vector<1x1x128xf32> to vector<1x128xf32>
    %499 = vector.broadcast %496 : vector<8x1xf32> to vector<8x128xf32>
    %500 = vector.broadcast %498 : vector<1x128xf32> to vector<8x128xf32>
    %501 = arith.mulf %499, %500 : vector<8x128xf32>
    %502 = arith.addf %494, %501 : vector<8x128xf32>
    %c63 = arith.constant 63 : index
    %c0_315 = arith.constant 0 : index
    %c0_316 = arith.constant 0 : index
    %503 = vector.load %arg1[%c63, %c0_315, %c0_316] : memref<64x8x1xf32, #tpu.memory_space<vmem>>, vector<1x8x1xf32>
    %504 = vector.shape_cast %503 : vector<1x8x1xf32> to vector<8x1xf32>
    %c63_317 = arith.constant 63 : index
    %c0_318 = arith.constant 0 : index
    %c0_319 = arith.constant 0 : index
    %505 = vector.load %arg0[%c63_317, %c0_318, %c0_319] : memref<64x1x128xf32, #tpu.memory_space<vmem>>, vector<1x1x128xf32>
    %506 = vector.shape_cast %505 : vector<1x1x128xf32> to vector<1x128xf32>
    %507 = vector.broadcast %504 : vector<8x1xf32> to vector<8x128xf32>
    %508 = vector.broadcast %506 : vector<1x128xf32> to vector<8x128xf32>
    %509 = arith.mulf %507, %508 : vector<8x128xf32>
    %510 = arith.addf %502, %509 : vector<8x128xf32>
    %cst = arith.constant dense<0.000000e+00> : vector<8xf32>
    %511 = vector.multi_reduction <add>, %510, %cst [1] : vector<8x128xf32> to vector<8xf32>
    %512 = vector.shape_cast %511 : vector<8xf32> to vector<8x1xf32>
    %cst_320 = arith.constant 7.812500e-03 : f32
    %513 = vector.broadcast %cst_320 : f32 to vector<8x1xf32>
    %514 = arith.mulf %512, %513 : vector<8x1xf32>
    %515 = vector.broadcast %514 : vector<8x1xf32> to vector<8x128xf32>
    %516 = arith.subf %510, %515 : vector<8x128xf32>
    %517 = arith.mulf %516, %516 : vector<8x128xf32>
    %cst_321 = arith.constant dense<0.000000e+00> : vector<8xf32>
    %518 = vector.multi_reduction <add>, %517, %cst_321 [1] : vector<8x128xf32> to vector<8xf32>
    %519 = vector.shape_cast %518 : vector<8xf32> to vector<8x1xf32>
    %cst_322 = arith.constant 7.812500e-03 : f32
    %520 = vector.broadcast %cst_322 : f32 to vector<8x1xf32>
    %521 = arith.mulf %519, %520 : vector<8x1xf32>
    %c0_323 = arith.constant 0 : index
    %c0_324 = arith.constant 0 : index
    %522 = vector.load %arg2[%c0_323, %c0_324] : memref<8x1xf32, #tpu.memory_space<vmem>>, vector<8x1xf32>
    %cst_325 = arith.constant 9.99999974E-6 : f32
    %523 = vector.broadcast %cst_325 : f32 to vector<8x1xf32>
    %524 = arith.addf %521, %523 : vector<8x1xf32>
    %525 = math.rsqrt %524 : vector<8x1xf32>
    %526 = arith.mulf %522, %525 : vector<8x1xf32>
    %527 = vector.broadcast %526 : vector<8x1xf32> to vector<8x128xf32>
    %528 = arith.mulf %516, %527 : vector<8x128xf32>
    %c0_326 = arith.constant 0 : index
    %c0_327 = arith.constant 0 : index
    %529 = vector.load %arg3[%c0_326, %c0_327] : memref<8x1xf32, #tpu.memory_space<vmem>>, vector<8x1xf32>
    %530 = vector.broadcast %529 : vector<8x1xf32> to vector<8x128xf32>
    %531 = arith.addf %528, %530 : vector<8x128xf32>
    %cst_328 = arith.constant 2.000000e-01 : f32
    %532 = vector.broadcast %cst_328 : f32 to vector<8x128xf32>
    %533 = arith.mulf %532, %531 : vector<8x128xf32>
    %534 = arith.maximumf %531, %533 : vector<8x128xf32>
    %c0_329 = arith.constant 0 : index
    %c0_330 = arith.constant 0 : index
    %535 = vector.load %arg4[%c0_329, %c0_330] : memref<8x128xf32, #tpu.memory_space<vmem>>, vector<8x128xf32>
    tpu.vector_store %arg4[%c0_329, %c0_330], %534 {strides = array<i32>} : memref<8x128xf32, #tpu.memory_space<vmem>>, vector<8x128xf32>,
    return
  }
}

</mosaic_0001>

<bundles_post_ra>
// kernel: tpu_custom_call.1
= control target key start
LH: loop header
LB: loop body
LE: loop exit
PB: predicated region body
PF: predicated region fallthrough
CT: control target
= control target key end

     0   :  { %v1187_v3 = vmov 0   ;;  %s1619_s0 = inlined_call_operand.vmem [shape: f32[64,1,128], index: 0, kind: input, shape index: {}]   ;;  %s1620_s1 = inlined_call_operand.vmem [shape: f32[64,8,1], index: 1, kind: input, shape index: {}]   ;;  %s1621_s2 = inlined_call_operand.vmem [shape: f32[8,1], index: 2, kind: input, shape index: {}]   ;;  %s1622_s3 = inlined_call_operand.vmem [shape: f32[8,1], index: 3, kind: input, shape index: {}]   ;;  %s1623_s4 = inlined_call_operand.hbm [shape: f32[8,128], index: 4, kind: output, shape index: {}]  }
   0x1   :  { %v970_v0 = vld [vmem:[%s1620_s1 + $0x20] sm:$0xff]  ;;  %v966_v1 = vld [vmem:[%s1620_s1 + $0x10] sm:$0xff]  ;;  %1094 = vset.pattern.permute.xlu2 %v1187_v3  ;;  %1093 = vset.pattern.permute.xlu1 %v1187_v3  ;;  %v972_v4 = vld [vmem:[%s1620_s1 + $0x28] sm:$0xff] }
   0x2   :  { %v18_v2 = vld [vmem:[%s1620_s1] sm:$0xff]  ;;  %1092 = vset.pattern.permute.xlu0 %v1187_v3  ;;  %77 = vperm.xlu2 %1094, %v970_v0   ;;  %v968_v5 = vld [vmem:[%s1620_s1 + $0x18] sm:$0xff]  ;;  %v964_v6 = vld [vmem:[%s1620_s1 + $0x8] sm:$0xff] }
   0x3   :  { %49 = vperm.xlu1 %1093, %v966_v1   ;;  %22 = vperm.xlu0 %1092, %v18_v2   ;;  %v978_v7 = vld [vmem:[%s1620_s1 + $0x40] sm:$0xff]  ;;  %v976_v8 = vld [vmem:[%s1620_s1 + $0x38] sm:$0xff]  ;;  %v974_v9 = vld [vmem:[%s1620_s1 + $0x30] sm:$0xff] }
   0x4   :  { %v984_v10 = vld [vmem:[%s1620_s1 + $0x58] sm:$0xff]  ;;  %v982_v11 = vld [vmem:[%s1620_s1 + $0x50] sm:$0xff]  ;;  %v980_v12 = vld [vmem:[%s1620_s1 + $0x48] sm:$0xff] }
   0xa   :  { %91 = vperm.xlu2 %1094, %v972_v4  }
   0xb   :  { %63 = vperm.xlu1 %1093, %v968_v5   ;;  %35 = vperm.xlu0 %1092, %v964_v6  }
  0x12   :  { %133 = vperm.xlu2 %1094, %v978_v7  }
  0x13   :  { %119 = vperm.xlu1 %1093, %v976_v8   ;;  %105 = vperm.xlu0 %1092, %v974_v9  }
  0x1a   :  { %175 = vperm.xlu2 %1094, %v984_v10  }
  0x1b   :  { %161 = vperm.xlu1 %1093, %v982_v11   ;;  %147 = vperm.xlu0 %1092, %v980_v12  }
  0x1c   :  { %9 = vsyncpa [#allocation3], 0  ;;  %v990_v13 = vld [vmem:[%s1620_s1 + $0x70] sm:$0xff]  ;;  %v988_v14 = vld [vmem:[%s1620_s1 + $0x68] sm:$0xff]  ;;  %s1188_s10 = smov [#allocation2]  }
  0x1d   :  { %v986_v15 = vld [vmem:[%s1620_s1 + $0x60] sm:$0xff]  ;;  %v996_v16 = vld [vmem:[%s1620_s1 + $0x88] sm:$0xff]  ;;  %v992_v18 = vld [vmem:[%s1620_s1 + $0x78] sm:$0xff]  ;;  %s953_s11 = sshll.u32 %s1188_s10, 4  ;;  %s954_s11 = int_to_ptr.vmem [resolvable:$true] %s953_s11 }
  0x1e   :  { %v994_v17 = vld [vmem:[%s1620_s1 + $0x80] sm:$0xff]  ;;  %v1000_v20 = vld [vmem:[%s1620_s1 + $0x98] sm:$0xff]  ;;  %v998_v21 = vld [vmem:[%s1620_s1 + $0x90] sm:$0xff] }
  0x1f   :  { %v1002_v19 = vld [vmem:[%s1620_s1 + $0xa0] sm:$0xff]  ;;  %v1008_v22 = vld [vmem:[%s1620_s1 + $0xb8] sm:$0xff]  ;;  %v1006_v23 = vld [vmem:[%s1620_s1 + $0xb0] sm:$0xff] }
  0x20   :  { %v1004_v24 = vld [vmem:[%s1620_s1 + $0xa8] sm:$0xff]  ;;  %v1014_v25 = vld [vmem:[%s1620_s1 + $0xd0] sm:$0xff]  ;;  %v1010_v27 = vld [vmem:[%s1620_s1 + $0xc0] sm:$0xff] }
  0x21   :  { %v1012_v26 = vld [vmem:[%s1620_s1 + $0xc8] sm:$0xff]  ;;  %v1018_v29 = vld [vmem:[%s1620_s1 + $0xe0] sm:$0xff]  ;;  %v1016_v30 = vld [vmem:[%s1620_s1 + $0xd8] sm:$0xff] }
  0x22   :  { %217 = vperm.xlu2 %1094, %v990_v13   ;;  %v1020_v28 = vld [vmem:[%s1620_s1 + $0xe8] sm:$0xff]  ;;  %v1026_v31 = vld [vmem:[%s1620_s1 + $0x100] sm:$0xff]  ;;  %v1024_v32 = vld [vmem:[%s1620_s1 + $0xf8] sm:$0xff] }
  0x23   :  { %203 = vperm.xlu1 %1093, %v988_v14   ;;  %189 = vperm.xlu0 %1092, %v986_v15   ;;  %v1022_v33 = vld [vmem:[%s1620_s1 + $0xf0] sm:$0xff]  ;;  %v1032_v34 = vld [vmem:[%s1620_s1 + $0x118] sm:$0xff]  ;;  %v1028_v36 = vld [vmem:[%s1620_s1 + $0x108] sm:$0xff] }
  0x24   :  { %v1030_v35 = vld [vmem:[%s1620_s1 + $0x110] sm:$0xff]  ;;  %v1036_v39 = vld [vmem:[%s1620_s1 + $0x128] sm:$0xff]  ;;  %v1034_v40 = vld [vmem:[%s1620_s1 + $0x120] sm:$0xff] }
  0x25   :  { %v1038_v38 = vld [vmem:[%s1620_s1 + $0x130] sm:$0xff]  ;;  %v1044_v42 = vld [vmem:[%s1620_s1 + $0x148] sm:$0xff]  ;;  %v1042_v43 = vld [vmem:[%s1620_s1 + $0x140] sm:$0xff] }
  0x26   :  { %v1040_v44 = vld [vmem:[%s1620_s1 + $0x138] sm:$0xff]  ;;  %v1050_v46 = vld [vmem:[%s1620_s1 + $0x160] sm:$0xff]  ;;  %v1046_v48 = vld [vmem:[%s1620_s1 + $0x150] sm:$0xff] }
  0x27   :  { %v1048_v47 = vld [vmem:[%s1620_s1 + $0x158] sm:$0xff]  ;;  %v1054_v53 = vld [vmem:[%s1620_s1 + $0x170] sm:$0xff]  ;;  %v1052_v54 = vld [vmem:[%s1620_s1 + $0x168] sm:$0xff] }
  0x28   :  { %v1056_v52 = vld [vmem:[%s1620_s1 + $0x178] sm:$0xff]  ;;  %v1100_v55 = vld [vmem:[%s1619_s0] ss:$0 sm:$0xff]  ;;  %v1103_v56 = vld [vmem:[%s1619_s0 + $0x1] ss:$0 sm:$0xff] }
  0x29   :  { %v1099_v57 = vld [vmem:[%s1619_s0 + $0x2] ss:$0 sm:$0xff]  ;;  %v1102_v62 = vld [vmem:[%s1619_s0 + $0x3] ss:$0 sm:$0xff]  ;;  %v1062_v0 = vld [vmem:[%s1620_s1 + $0x190] sm:$0xff] }
  0x2a   :  { %259 = vperm.xlu2 %1094, %v996_v16   ;;  %v1095_v1 = vld [vmem:[%s1619_s0 + $0x4] ss:$0 sm:$0xff]  ;;  %v1060_v4 = vld [vmem:[%s1620_s1 + $0x188] sm:$0xff]  ;;  %v1096_v6 = vld [vmem:[%s1619_s0 + $0x5] ss:$0 sm:$0xff] }
  0x2b   :  { %245 = vperm.xlu1 %1093, %v994_v17   ;;  %231 = vperm.xlu0 %1092, %v992_v18   ;;  %v1058_v5 = vld [vmem:[%s1620_s1 + $0x180] sm:$0xff]  ;;  %v1068_v18 = vld [vmem:[%s1620_s1 + $0x1a8] sm:$0xff] }
  0x2c   :  { %v1106_v12 = vld [vmem:[%s1619_s0 + $0x6] ss:$0 sm:$0xff]  ;;  %v1105_v16 = vld [vmem:[%s1619_s0 + $0x7] ss:$0 sm:$0xff] }
  0x32   :  { %301 = vperm.xlu2 %1094, %v1002_v19   ;;  %v1097_v19 = vld [vmem:[%s1619_s0 + $0x8] ss:$0 sm:$0xff] }
  0x33   :  { %287 = vperm.xlu1 %1093, %v1000_v20   ;;  %273 = vperm.xlu0 %1092, %v998_v21  }
  0x3a   :  { %343 = vperm.xlu2 %1094, %v1008_v22   ;;  %v1066_v22 = vld [vmem:[%s1620_s1 + $0x1a0] sm:$0xff] }
  0x3b   :  { %329 = vperm.xlu1 %1093, %v1006_v23   ;;  %315 = vperm.xlu0 %1092, %v1004_v24   ;;  %v1064_v23 = vld [vmem:[%s1620_s1 + $0x198] sm:$0xff] }
  0x42   :  { %385 = vperm.xlu2 %1094, %v1014_v25  }
  0x43   :  { %371 = vperm.xlu1 %1093, %v1012_v26   ;;  %357 = vperm.xlu0 %1092, %v1010_v27   ;;  %v1109_v26 = vld [vmem:[%s1619_s0 + $0x9] ss:$0 sm:$0xff] }
  0x4a   :  { %427 = vperm.xlu2 %1094, %v1020_v28  }
  0x4b   :  { %413 = vperm.xlu1 %1093, %v1018_v29   ;;  %399 = vperm.xlu0 %1092, %v1016_v30   ;;  %v1108_v30 = vld [vmem:[%s1619_s0 + $0xa] ss:$0 sm:$0xff] }
  0x52   :  { %469 = vperm.xlu2 %1094, %v1026_v31  }
  0x53   :  { %455 = vperm.xlu1 %1093, %v1024_v32   ;;  %441 = vperm.xlu0 %1092, %v1022_v33  }
  0x5a   :  { %511 = vperm.xlu2 %1094, %v1032_v34  }
  0x5b   :  { %497 = vperm.xlu1 %1093, %v1030_v35   ;;  %483 = vperm.xlu0 %1092, %v1028_v36   ;;  %v1074_v35 = vld [vmem:[%s1620_s1 + $0x1c0] sm:$0xff]  ;;  %v1098_v36 = vld [vmem:[%s1619_s0 + $0xb] ss:$0 sm:$0xff] }
  0x5c   :  { %v78_v37 = vpop.permute.xlu2 %77 }
  0x5d   :  { %v83_v9 = vmul.f32 %v1095_v1, %v78_v37  ;;  %v1086_v1 = vld [vmem:[%s1620_s1 + $0x1f0] sm:$0xff] }
  0x62   :  { %553 = vperm.xlu2 %1094, %v1038_v38  }
  0x63   :  { %539 = vperm.xlu1 %1093, %v1036_v39   ;;  %525 = vperm.xlu0 %1092, %v1034_v40   ;;  %v1072_v39 = vld [vmem:[%s1620_s1 + $0x1b8] sm:$0xff]  ;;  %v1070_v40 = vld [vmem:[%s1620_s1 + $0x1b0] sm:$0xff] }
  0x64   :  { %v92_v41 = vpop.permute.xlu2 %91 }
  0x65   :  { %v97_v15 = vmul.f32 %v1096_v6, %v92_v41  ;;  %v1082_v6 = vld [vmem:[%s1620_s1 + $0x1e0] sm:$0xff] }
  0x6a   :  { %595 = vperm.xlu2 %1094, %v1044_v42   ;;  %v1112_v42 = vld [vmem:[%s1619_s0 + $0xc] ss:$0 sm:$0xff] }
  0x6b   :  { %581 = vperm.xlu1 %1093, %v1042_v43   ;;  %567 = vperm.xlu0 %1092, %v1040_v44   ;;  %v1111_v44 = vld [vmem:[%s1619_s0 + $0xd] ss:$0 sm:$0xff] }
  0x6c   :  { %v134_v45 = vpop.permute.xlu2 %133 }
  0x6d   :  { %v139_v27 = vmul.f32 %v1097_v19, %v134_v45  ;;  %v1088_v19 = vld [vmem:[%s1620_s1 + $0x1f8] sm:$0xff] }
  0x72   :  { %637 = vperm.xlu2 %1094, %v1050_v46  }
  0x73   :  { %623 = vperm.xlu1 %1093, %v1048_v47   ;;  %609 = vperm.xlu0 %1092, %v1046_v48  }
  0x74   :  { %v1349_v49 = vpop.permute.xlu2 %175 }
  0x75   :  { %v50_v50 = vpop.permute.xlu1 %49  ;;  %v23_v51 = vpop.permute.xlu0 %22  ;;  %v181_v43 = vmul.f32 %v1098_v36, %v1349_v49  ;;  %v1078_v49 = vld [vmem:[%s1620_s1 + $0x1d0] sm:$0xff] }
  0x76   :  { %v28_v61 = vmul.f32 %v1100_v55, %v23_v51  ;;  %v55_v2 = vmul.f32 %v1099_v57, %v50_v50  ;;  %v1080_v51 = vld [vmem:[%s1620_s1 + $0x1d8] sm:$0xff]  ;;  %v1076_v55 = vld [vmem:[%s1620_s1 + $0x1c8] sm:$0xff] }
  0x77   :  { %v1115_v57 = vld [vmem:[%s1619_s0 + $0xf] ss:$0 sm:$0xff] }
  0x7a   :  { %679 = vperm.xlu2 %1094, %v1056_v52   ;;  %v1101_v52 = vld [vmem:[%s1619_s0 + $0xe] ss:$0 sm:$0xff] }
  0x7b   :  { %665 = vperm.xlu1 %1093, %v1054_v53   ;;  %651 = vperm.xlu0 %1092, %v1052_v54  }
  0x7c   :  { %v1369_v58 = vpop.permute.xlu2 %217 }
  0x7d   :  { %v64_v59 = vpop.permute.xlu1 %63  ;;  %v36_v60 = vpop.permute.xlu0 %35 }
  0x7e   :  { %v41_v63 = vmul.f32 %v1103_v56, %v36_v60  ;;  %v69_v7 = vmul.f32 %v1102_v62, %v64_v59  ;;  %v223_v59 = vmul.f32 %v1101_v52, %v1369_v58  ;;  %v1114_v60 = vld [vmem:[%s1619_s0 + $0x10] ss:$0 sm:$0xff]  ;;  %v1084_v58 = vld [vmem:[%s1620_s1 + $0x1e8] sm:$0xff] }
  0x80   :  { %v42_v3 = vadd.f32 %v41_v63, %v28_v61 }
  0x82   :  { %v56_v8 = vadd.f32 %v55_v2, %v42_v3  ;;  %721 = vperm.xlu2 %1094, %v1062_v0   ;;  %v1104_v2 = vld [vmem:[%s1619_s0 + $0x11] ss:$0 sm:$0xff] }
  0x83   :  { %707 = vperm.xlu1 %1093, %v1060_v4   ;;  %693 = vperm.xlu0 %1092, %v1058_v5  }
  0x84   :  { %v70_v10 = vadd.f32 %v69_v7, %v56_v8  ;;  %v1389_v11 = vpop.permute.xlu2 %259  ;;  %v1118_v8 = vld [vmem:[%s1619_s0 + $0x12] ss:$0 sm:$0xff] }
  0x85   :  { %v120_v13 = vpop.permute.xlu1 %119  ;;  %v106_v14 = vpop.permute.xlu0 %105 }
  0x86   :  { %v84_v17 = vadd.f32 %v83_v9, %v70_v10  ;;  %v111_v21 = vmul.f32 %v1106_v12, %v106_v14  ;;  %v125_v24 = vmul.f32 %v1105_v16, %v120_v13  ;;  %v265_v9 = vmul.f32 %v1104_v2, %v1389_v11  ;;  %v1117_v10 = vld [vmem:[%s1619_s0 + $0x13] ss:$0 sm:$0xff]  ;;  %v1107_v16 = vld [vmem:[%s1619_s0 + $0x14] ss:$0 sm:$0xff] }
  0x88   :  { %v98_v20 = vadd.f32 %v97_v15, %v84_v17 }
  0x8a   :  { %v112_v25 = vadd.f32 %v111_v21, %v98_v20  ;;  %763 = vperm.xlu2 %1094, %v1068_v18   ;;  %v1121_v21 = vld [vmem:[%s1619_s0 + $0x15] ss:$0 sm:$0xff] }
  0x8b   :  { %749 = vperm.xlu1 %1093, %v1066_v22   ;;  %735 = vperm.xlu0 %1092, %v1064_v23   ;;  %v1120_v23 = vld [vmem:[%s1619_s0 + $0x16] ss:$0 sm:$0xff] }
  0x8c   :  { %v126_v28 = vadd.f32 %v125_v24, %v112_v25  ;;  %v1412_v29 = vpop.permute.xlu2 %301 }
  0x8d   :  { %v162_v31 = vpop.permute.xlu1 %161  ;;  %v148_v32 = vpop.permute.xlu0 %147  ;;  %v307_v22 = vmul.f32 %v1107_v16, %v1412_v29 }
  0x8e   :  { %v140_v33 = vadd.f32 %v139_v27, %v126_v28  ;;  %v153_v34 = vmul.f32 %v1109_v26, %v148_v32  ;;  %v167_v37 = vmul.f32 %v1108_v30, %v162_v31  ;;  %v1110_v28 = vld [vmem:[%s1619_s0 + $0x17] ss:$0 sm:$0xff] }
  0x90   :  { %v154_v38 = vadd.f32 %v153_v34, %v140_v33  ;;  %v1124_v33 = vld [vmem:[%s1619_s0 + $0x18] ss:$0 sm:$0xff] }
  0x92   :  { %v168_v41 = vadd.f32 %v167_v37, %v154_v38  ;;  %805 = vperm.xlu2 %1094, %v1074_v35   ;;  %v1123_v35 = vld [vmem:[%s1619_s0 + $0x19] ss:$0 sm:$0xff] }
  0x93   :  { %791 = vperm.xlu1 %1093, %v1072_v39   ;;  %777 = vperm.xlu0 %1092, %v1070_v40   ;;  %v1113_v40 = vld [vmem:[%s1619_s0 + $0x1a] ss:$0 sm:$0xff] }
  0x94   :  { %v344_v47 = vpop.permute.xlu2 %343  ;;  %v182_v48 = vadd.f32 %v181_v43, %v168_v41 }
  0x95   :  { %v204_v45 = vpop.permute.xlu1 %203  ;;  %v190_v46 = vpop.permute.xlu0 %189  ;;  %v349_v29 = vmul.f32 %v1110_v28, %v344_v47 }
  0x96   :  { %v195_v50 = vmul.f32 %v1112_v42, %v190_v46  ;;  %v209_v53 = vmul.f32 %v1111_v44, %v204_v45  ;;  %v1127_v44 = vld [vmem:[%s1619_s0 + $0x1b] ss:$0 sm:$0xff]  ;;  %v1126_v46 = vld [vmem:[%s1619_s0 + $0x1c] ss:$0 sm:$0xff] }
  0x98   :  { %v196_v54 = vadd.f32 %v195_v50, %v182_v48 }
  0x9a   :  { %v210_v56 = vadd.f32 %v209_v53, %v196_v54  ;;  %847 = vperm.xlu2 %1094, %v1080_v51   ;;  %v1116_v53 = vld [vmem:[%s1619_s0 + $0x1d] ss:$0 sm:$0xff] }
  0x9b   :  { %833 = vperm.xlu1 %1093, %v1078_v49   ;;  %819 = vperm.xlu0 %1092, %v1076_v55  }
  0x9c   :  { %v224_v63 = vadd.f32 %v223_v59, %v210_v56  ;;  %v386_v3 = vpop.permute.xlu2 %385  ;;  %v1130_v56 = vld [vmem:[%s1619_s0 + $0x1e] ss:$0 sm:$0xff]  ;;  %v1129_v59 = vld [vmem:[%s1619_s0 + $0x1f] ss:$0 sm:$0xff] }
  0x9d   :  { %v246_v61 = vpop.permute.xlu1 %245  ;;  %v232_v62 = vpop.permute.xlu0 %231  ;;  %v391_v45 = vmul.f32 %v1113_v40, %v386_v3 }
  0x9e   :  { %v237_v0 = vmul.f32 %v1115_v57, %v232_v62  ;;  %v251_v4 = vmul.f32 %v1114_v60, %v246_v61 }
  0xa0   :  { %v238_v5 = vadd.f32 %v237_v0, %v224_v63  ;;  %v1119_v0 = vld [vmem:[%s1619_s0 + $0x20] ss:$0 sm:$0xff] }
  0xa2   :  { %v252_v7 = vadd.f32 %v251_v4, %v238_v5  ;;  %889 = vperm.xlu2 %1094, %v1086_v1   ;;  %v1133_v5 = vld [vmem:[%s1619_s0 + $0x21] ss:$0 sm:$0xff] }
  0xa3   :  { %875 = vperm.xlu1 %1093, %v1084_v58   ;;  %861 = vperm.xlu0 %1092, %v1082_v6   ;;  %v1132_v6 = vld [vmem:[%s1619_s0 + $0x22] ss:$0 sm:$0xff] }
  0xa4   :  { %v266_v14 = vadd.f32 %v265_v9, %v252_v7  ;;  %v428_v20 = vpop.permute.xlu2 %427 }
  0xa5   :  { %v288_v12 = vpop.permute.xlu1 %287  ;;  %v274_v13 = vpop.permute.xlu0 %273  ;;  %v433_v57 = vmul.f32 %v1116_v53, %v428_v20 }
  0xa6   :  { %v279_v15 = vmul.f32 %v1118_v8, %v274_v13  ;;  %v293_v17 = vmul.f32 %v1117_v10, %v288_v12  ;;  %v1122_v12 = vld [vmem:[%s1619_s0 + $0x23] ss:$0 sm:$0xff] }
  0xa8   :  { %v280_v18 = vadd.f32 %v279_v15, %v266_v14 }
  0xaa   :  { %v294_v11 = vadd.f32 %v293_v17, %v280_v18  ;;  %v1136_v17 = vld [vmem:[%s1619_s0 + $0x24] ss:$0 sm:$0xff] }
  0xab   :  { %903 = vperm.xlu0 %1092, %v1088_v19   ;;  %v1135_v19 = vld [vmem:[%s1619_s0 + $0x25] ss:$0 sm:$0xff] }
  0xac   :  { %v308_v26 = vadd.f32 %v307_v22, %v294_v11  ;;  %v470_v34 = vpop.permute.xlu2 %469 }
  0xad   :  { %v330_v24 = vpop.permute.xlu1 %329  ;;  %v316_v25 = vpop.permute.xlu0 %315  ;;  %v475_v58 = vmul.f32 %v1119_v0, %v470_v34  ;;  %v1148_v0 = vld [vmem:[%s1619_s0 + $0x30] ss:$0 sm:$0xff] }
  0xae   :  { %v321_v27 = vmul.f32 %v1121_v21, %v316_v25  ;;  %v335_v30 = vmul.f32 %v1120_v23, %v330_v24  ;;  %v1125_v23 = vld [vmem:[%s1619_s0 + $0x26] ss:$0 sm:$0xff] }
  0xb0   :  { %v322_v31 = vadd.f32 %v321_v27, %v308_v26  ;;  %v1139_v27 = vld [vmem:[%s1619_s0 + $0x27] ss:$0 sm:$0xff] }
  0xb2   :  { %v336_v32 = vadd.f32 %v335_v30, %v322_v31  ;;  %v1138_v31 = vld [vmem:[%s1619_s0 + $0x28] ss:$0 sm:$0xff] }
  0xb4   :  { %v350_v38 = vadd.f32 %v349_v29, %v336_v32  ;;  %v512_v50 = vpop.permute.xlu2 %511 }
  0xb5   :  { %v372_v36 = vpop.permute.xlu1 %371  ;;  %v358_v37 = vpop.permute.xlu0 %357  ;;  %v517_v18 = vmul.f32 %v1122_v12, %v512_v50  ;;  %v1151_v12 = vld [vmem:[%s1619_s0 + $0x33] ss:$0 sm:$0xff] }
  0xb6   :  { %v363_v39 = vmul.f32 %v1124_v33, %v358_v37  ;;  %v377_v41 = vmul.f32 %v1123_v35, %v372_v36  ;;  %v1128_v35 = vld [vmem:[%s1619_s0 + $0x29] ss:$0 sm:$0xff] }
  0xb8   :  { %v364_v42 = vadd.f32 %v363_v39, %v350_v38  ;;  %v1142_v39 = vld [vmem:[%s1619_s0 + $0x2a] ss:$0 sm:$0xff] }
  0xba   :  { %v378_v43 = vadd.f32 %v377_v41, %v364_v42  ;;  %v1141_v41 = vld [vmem:[%s1619_s0 + $0x2b] ss:$0 sm:$0xff] }
  0xbc   :  { %v392_v51 = vadd.f32 %v391_v45, %v378_v43  ;;  %v554_v1 = vpop.permute.xlu2 %553 }
  0xbd   :  { %v414_v47 = vpop.permute.xlu1 %413  ;;  %v400_v48 = vpop.permute.xlu0 %399  ;;  %v559_v28 = vmul.f32 %v1125_v23, %v554_v1 }
  0xbe   :  { %v405_v52 = vmul.f32 %v1127_v44, %v400_v48  ;;  %v419_v54 = vmul.f32 %v1126_v46, %v414_v47  ;;  %v1131_v47 = vld [vmem:[%s1619_s0 + $0x2c] ss:$0 sm:$0xff] }
  0xc0   :  { %v406_v49 = vadd.f32 %v405_v52, %v392_v51  ;;  %v1145_v52 = vld [vmem:[%s1619_s0 + $0x2d] ss:$0 sm:$0xff] }
  0xc2   :  { %v420_v55 = vadd.f32 %v419_v54, %v406_v49  ;;  %v1144_v54 = vld [vmem:[%s1619_s0 + $0x2e] ss:$0 sm:$0xff] }
  0xc4   :  { %v434_v62 = vadd.f32 %v433_v57, %v420_v55  ;;  %v596_v15 = vpop.permute.xlu2 %595 }
  0xc5   :  { %v456_v60 = vpop.permute.xlu1 %455  ;;  %v442_v61 = vpop.permute.xlu0 %441  ;;  %v601_v40 = vmul.f32 %v1128_v35, %v596_v15 }
  0xc6   :  { %v447_v63 = vmul.f32 %v1130_v56, %v442_v61  ;;  %v461_v2 = vmul.f32 %v1129_v59, %v456_v60  ;;  %v1134_v59 = vld [vmem:[%s1619_s0 + $0x2f] ss:$0 sm:$0xff] }
  0xc8   :  { %v448_v3 = vadd.f32 %v447_v63, %v434_v62 }
  0xca   :  { %v462_v4 = vadd.f32 %v461_v2, %v448_v3  ;;  %v1147_v2 = vld [vmem:[%s1619_s0 + $0x31] ss:$0 sm:$0xff] }
  0xcc   :  { %v476_v9 = vadd.f32 %v475_v58, %v462_v4  ;;  %v638_v30 = vpop.permute.xlu2 %637 }
  0xcd   :  { %v498_v7 = vpop.permute.xlu1 %497  ;;  %v484_v8 = vpop.permute.xlu0 %483  ;;  %v643_v53 = vmul.f32 %v1131_v47, %v638_v30 }
  0xce   :  { %v489_v10 = vmul.f32 %v1133_v5, %v484_v8  ;;  %v503_v13 = vmul.f32 %v1132_v6, %v498_v7  ;;  %v1137_v6 = vld [vmem:[%s1619_s0 + $0x32] ss:$0 sm:$0xff] }
  0xd0   :  { %v490_v14 = vadd.f32 %v489_v10, %v476_v9 }
  0xd2   :  { %v504_v16 = vadd.f32 %v503_v13, %v490_v14  ;;  %v1150_v14 = vld [vmem:[%s1619_s0 + $0x34] ss:$0 sm:$0xff] }
  0xd4   :  { %v518_v21 = vadd.f32 %v517_v18, %v504_v16  ;;  %v680_v44 = vpop.permute.xlu2 %679 }
  0xd5   :  { %v540_v20 = vpop.permute.xlu1 %539  ;;  %v526_v11 = vpop.permute.xlu0 %525  ;;  %v685_v1 = vmul.f32 %v1134_v59, %v680_v44  ;;  %v1158_v59 = vld [vmem:[%s1619_s0 + $0x3f] ss:$0 sm:$0xff] }
  0xd6   :  { %v531_v22 = vmul.f32 %v1136_v17, %v526_v11  ;;  %v545_v24 = vmul.f32 %v1135_v19, %v540_v20  ;;  %v1140_v19 = vld [vmem:[%s1619_s0 + $0x35] ss:$0 sm:$0xff] }
  0xd8   :  { %v532_v25 = vadd.f32 %v531_v22, %v518_v21  ;;  %v1153_v22 = vld [vmem:[%s1619_s0 + $0x36] ss:$0 sm:$0xff] }
  0xda   :  { %v546_v26 = vadd.f32 %v545_v24, %v532_v25  ;;  %v1152_v25 = vld [vmem:[%s1619_s0 + $0x37] ss:$0 sm:$0xff] }
  0xdc   :  { %v560_v29 = vadd.f32 %v559_v28, %v546_v26  ;;  %v722_v60 = vpop.permute.xlu2 %721 }
  0xdd   :  { %v582_v32 = vpop.permute.xlu1 %581  ;;  %v568_v33 = vpop.permute.xlu0 %567  ;;  %v727_v13 = vmul.f32 %v1137_v6, %v722_v60 }
  0xde   :  { %v573_v34 = vmul.f32 %v1139_v27, %v568_v33  ;;  %v587_v36 = vmul.f32 %v1138_v31, %v582_v32  ;;  %v1143_v31 = vld [vmem:[%s1619_s0 + $0x38] ss:$0 sm:$0xff] }
  0xe0   :  { %v574_v37 = vadd.f32 %v573_v34, %v560_v29  ;;  %v1155_v34 = vld [vmem:[%s1619_s0 + $0x39] ss:$0 sm:$0xff] }
  0xe2   :  { %v588_v38 = vadd.f32 %v587_v36, %v574_v37  ;;  %v1154_v36 = vld [vmem:[%s1619_s0 + $0x3a] ss:$0 sm:$0xff] }
  0xe4   :  { %v602_v45 = vadd.f32 %v601_v40, %v588_v38  ;;  %v764_v9 = vpop.permute.xlu2 %763 }
  0xe5   :  { %v624_v42 = vpop.permute.xlu1 %623  ;;  %v610_v43 = vpop.permute.xlu0 %609  ;;  %v769_v23 = vmul.f32 %v1140_v19, %v764_v9 }
  0xe6   :  { %v615_v46 = vmul.f32 %v1142_v39, %v610_v43  ;;  %v629_v48 = vmul.f32 %v1141_v41, %v624_v42  ;;  %v1146_v42 = vld [vmem:[%s1619_s0 + $0x3b] ss:$0 sm:$0xff] }
  0xe8   :  { %v616_v50 = vadd.f32 %v615_v46, %v602_v45  ;;  %v1157_v46 = vld [vmem:[%s1619_s0 + $0x3c] ss:$0 sm:$0xff] }
  0xea   :  { %v630_v51 = vadd.f32 %v629_v48, %v616_v50  ;;  %v1156_v48 = vld [vmem:[%s1619_s0 + $0x3d] ss:$0 sm:$0xff] }
  0xec   :  { %v644_v56 = vadd.f32 %v643_v53, %v630_v51  ;;  %v806_v24 = vpop.permute.xlu2 %805 }
  0xed   :  { %v666_v49 = vpop.permute.xlu1 %665  ;;  %v652_v55 = vpop.permute.xlu0 %651  ;;  %v811_v35 = vmul.f32 %v1143_v31, %v806_v24 }
  0xee   :  { %v657_v57 = vmul.f32 %v1145_v52, %v652_v55  ;;  %v671_v61 = vmul.f32 %v1144_v54, %v666_v49  ;;  %v1149_v54 = vld [vmem:[%s1619_s0 + $0x3e] ss:$0 sm:$0xff] }
  0xf0   :  { %v658_v62 = vadd.f32 %v657_v57, %v644_v56 }
  0xf2   :  { %v672_v63 = vadd.f32 %v671_v61, %v658_v62 }
  0xf4   :  { %v686_v5 = vadd.f32 %v685_v1, %v672_v63  ;;  %v848_v41 = vpop.permute.xlu2 %847 }
  0xf5   :  { %v708_v3 = vpop.permute.xlu1 %707  ;;  %v694_v4 = vpop.permute.xlu0 %693  ;;  %v853_v47 = vmul.f32 %v1146_v42, %v848_v41 }
  0xf6   :  { %v699_v58 = vmul.f32 %v1148_v0, %v694_v4  ;;  %v713_v7 = vmul.f32 %v1147_v2, %v708_v3 }
  0xf8   :  { %v700_v8 = vadd.f32 %v699_v58, %v686_v5 }
  0xfa   :  { %v714_v10 = vadd.f32 %v713_v7, %v700_v8 }
  0xfc   :  { %v728_v17 = vadd.f32 %v727_v13, %v714_v10  ;;  %v890_v56 = vpop.permute.xlu2 %889  ;;  %v919_v13 = vld [vmem:[%s1621_s2] sm:$0xff]  ;;  %s955_s2 = sshll.u32 %s1623_s4, 4  ;;  %s956_s2 = int_to_ptr.hbm [resolvable:$true] %s955_s2 }
  0xfd   :  { %v750_v15 = vpop.permute.xlu1 %749  ;;  %v736_v16 = vpop.permute.xlu0 %735  ;;  %v895_v60 = vmul.f32 %v1149_v54, %v890_v56 }
  0xfe   :  { %v741_v18 = vmul.f32 %v1151_v12, %v736_v16  ;;  %v755_v20 = vmul.f32 %v1150_v14, %v750_v15 }
 0x100   :  { %v742_v11 = vadd.f32 %v741_v18, %v728_v17  ;;  %v938_v17 = vld [vmem:[%s1622_s3] sm:$0xff] }
 0x102   :  { %v756_v21 = vadd.f32 %v755_v20, %v742_v11 }
 0x104   :  { %v770_v28 = vadd.f32 %v769_v23, %v756_v21 }
 0x105   :  { %v792_v26 = vpop.permute.xlu1 %791  ;;  %v778_v27 = vpop.permute.xlu0 %777 }
 0x106   :  { %v783_v30 = vmul.f32 %v1153_v22, %v778_v27  ;;  %v797_v32 = vmul.f32 %v1152_v25, %v792_v26 }
 0x108   :  { %v784_v33 = vadd.f32 %v783_v30, %v770_v28 }
 0x10a   :  { %v798_v29 = vadd.f32 %v797_v32, %v784_v33 }
 0x10c   :  { %v812_v39 = vadd.f32 %v811_v35, %v798_v29 }
 0x10d   :  { %v834_v37 = vpop.permute.xlu1 %833  ;;  %v820_v38 = vpop.permute.xlu0 %819 }
 0x10e   :  { %v825_v40 = vmul.f32 %v1155_v34, %v820_v38  ;;  %v839_v43 = vmul.f32 %v1154_v36, %v834_v37 }
 0x110   :  { %v826_v44 = vadd.f32 %v825_v40, %v812_v39 }
 0x112   :  { %v840_v45 = vadd.f32 %v839_v43, %v826_v44 }
 0x114   :  { %v854_v52 = vadd.f32 %v853_v47, %v840_v45 }
 0x115   :  { %v876_v50 = vpop.permute.xlu1 %875  ;;  %v862_v51 = vpop.permute.xlu0 %861 }
 0x116   :  { %v867_v53 = vmul.f32 %v1157_v46, %v862_v51  ;;  %v881_v49 = vmul.f32 %v1156_v48, %v876_v50 }
 0x118   :  { %v868_v55 = vadd.f32 %v867_v53, %v854_v52 }
 0x11a   :  { %v882_v57 = vadd.f32 %v881_v49, %v868_v55 }
 0x11c   :  { %v896_v63 = vadd.f32 %v895_v60, %v882_v57 }
 0x11d   :  { %v904_v61 = vpop.permute.xlu0 %903 }
 0x11e   :  { %v909_v62 = vmul.f32 %v1158_v59, %v904_v61 }
 0x120   :  { %v910_v0 = vadd.f32 %v909_v62, %v896_v63 }
 0x122   :  { %911 = vadd.xlane.f32.xlu1 %v910_v0 }
 0x195   :  { %v912_v1 = vpop.xlane.xlu1 %911 }
 0x196   :  { %v913_v2 = vmul.f32 0.0078125, %v912_v1 }
 0x198   :  { %v914_v3 = vsub.f32 %v910_v0, %v913_v2 }
 0x19a   :  { %v915_v4 = vmul.f32 %v914_v3, %v914_v3 }
 0x19c   :  { %916 = vadd.xlane.f32.xlu2 %v915_v4 }
 0x20f   :  { %v917_v5 = vpop.xlane.xlu2 %916 }
 0x210   :  { %v918_v58 = vmul.f32 0.0078125, %v917_v5 }
 0x212   :  { %v920_v6 = vadd.f32 1e-05, %v918_v58 }
 0x214   :  { %1159 = vrsqrt.f32 %v920_v6  ;;  %vm927_vm1 = vweird.f32 %v920_v6 }
 0x21a   :  { %v1160_v7 = vpop.eup %1159 }
 0x21b   :  { %v922_v8 = vmul.f32 %v1160_v7, %v920_v6  ;;  %vm928_vm0 = vweird.f32 %v1160_v7 }
 0x21c   :  { %vm929_vm2 = vmor %vm927_vm1, %vm928_vm0 }
 0x21d   :  { %v923_v9 = vmul.f32 %v1160_v7, %v922_v8 }
 0x21f   :  { %v924_v10 = vmul.f32 0.5, %v923_v9 }
 0x221   :  { %v925_v12 = vsub.f32 1.5, %v924_v10 }
 0x223   :  { %v926_v14 = vmul.f32 %v1160_v7, %v925_v12 }
 0x225   :  { %v930_v15 = vsel %vm929_vm2, %v1160_v7, %v926_v14 }
 0x226   :  { %v931_v16 = vmul.f32 %v930_v15, %v919_v13 }
 0x228   :  { %934 = vperm.xlu0 %1092, %v931_v16  }
 0x230   :  { %941 = vperm.xlu0 %1092, %v938_v17  }
 0x29a   :  { %v935_v18 = vpop.permute.xlu0 %934 }
 0x29b   :  { %v937_v19 = vmul.f32 %v935_v18, %v914_v3 }
 0x2a2   :  { %v942_v20 = vpop.permute.xlu0 %941 }
 0x2a3   :  { %v944_v11 = vadd.f32 %v942_v20, %v937_v19 }
 0x2a5   :  { %v945_v21 = vmul.f32 0.2, %v944_v11 }
 0x2a7   :  { %v946_v22 = vmax.f32 %v944_v11, %v945_v21 }
 0x2a9   :  { %947 = vst [vmem:[#allocation2] sm:$0xff] %v946_v22 }
 0x2aa   :  { %958 = dma.vmem_to_hbm [thread:$0]  %s954_s11, 128, %s956_s2, [#allocation3]  }
 0x2ab   :  { %1185 = dma.done.wait [#allocation3], 128  }
 0x2ac   :  { %1186 = vsyncadd [#allocation3], 4294967168 }
 0x2ad   :  { %963 = vsyncpa [#allocation3], 1 }

</bundles_post_ra>
